<compile_context>
chip_gen: v7x
topology: tpu7x:2x2x1
jax: 0.10.0
libtpu: 0.0.40
codegen_flags: <defaults>
</compile_context>

<pallas_src>
import functools

import jax
import jax.numpy as jnp
from jax.experimental import pallas as pl
from jax.experimental.pallas import tpu as pltpu


def _gbn_kernel_grouped(x_ref, gamma_ref, beta_ref, o_ref, *, eps, inv_l, inv_lm1):
    # x_ref:     (1, Gt, Cg, HW)   one batch element, Gt groups
    # gamma_ref: (1, Gt, Cg, 1)    per-channel affine params (tiny)
    # beta_ref:  (1, Gt, Cg, 1)
    x = x_ref[...].astype(jnp.float32)

    # Single-pass moments over (Cg, HW): s1 = sum(x), s2 = sum(x*x).
    s1 = jnp.sum(jnp.sum(x, axis=3, keepdims=True), axis=2, keepdims=True)
    s2 = jnp.sum(jnp.sum(x * x, axis=3, keepdims=True), axis=2, keepdims=True)
    mean = s1 * inv_l                                    # (1, Gt, 1, 1)
    # Unbiased variance (L-1 divisor), clamped against tiny cancellation.
    var = jnp.maximum((s2 - s1 * mean) * inv_lm1, 0.0)
    # 1/(std + eps) on Gt scalars -> EUP slot, essentially free.
    inv_std = pl.reciprocal(jnp.sqrt(var) + eps, approx=True)

    # Fold gamma/mean into per-row scale/shift -> one FMA per element.
    g = gamma_ref[...].astype(jnp.float32)
    b = beta_ref[...].astype(jnp.float32)
    scale = g * inv_std                                  # (1, Gt, Cg, 1)
    shift = b - mean * scale                             # (1, Gt, Cg, 1)
    o_ref[...] = (x * scale + shift).astype(o_ref.dtype)


def _gbn_kernel_flat(x_ref, gamma_ref, beta_ref, o_ref, *, eps, inv_l, inv_lm1):
    # Fallback: x_ref (1, G, L); gamma/beta pre-broadcast to (1, G, L).
    x = x_ref[...].astype(jnp.float32)
    s1 = jnp.sum(x, axis=-1, keepdims=True)
    s2 = jnp.sum(x * x, axis=-1, keepdims=True)
    mean = s1 * inv_l
    var = jnp.maximum((s2 - s1 * mean) * inv_lm1, 0.0)
    inv_std = pl.reciprocal(jnp.sqrt(var) + eps, approx=True)   # (1, G, 1)
    y = (x - mean) * inv_std
    g = gamma_ref[...].astype(jnp.float32)
    b = beta_ref[...].astype(jnp.float32)
    o_ref[...] = (y * g + b).astype(o_ref.dtype)


def _largest_divisor_leq(n, cap):
    cap = max(1, min(n, cap))
    for d in range(cap, 0, -1):
        if n % d == 0:
            return d
    return 1


def group_batchnorm2d(x, gamma, beta, group_num=16, eps=1e-10):
    """Forward pass of GroupBatchnorm2d (matches the PyTorch module).

    x:     (N, C, H, W)
    gamma: (C, 1, 1)
    beta:  (C, 1, 1)
    """
    N, C, H, W = x.shape
    G = group_num
    assert (C * H * W) % G == 0, "C*H*W must be divisible by group_num"
    L = (C * H * W) // G
    assert L > 1, "need more than one element per group (std uses L-1)"

    eps = float(eps)
    inv_l = 1.0 / float(L)
    inv_lm1 = 1.0 / float(L - 1)

    if C % G == 0:
        # ----------------- optimized per-channel path -----------------
        Cg = C // G
        HW = H * W
        x_g = x.reshape(N, G, Cg, HW)
        gamma_g = gamma.reshape(1, G, Cg, 1)
        beta_g = beta.reshape(1, G, Cg, 1)

        # Groups per grid step: keep the streamed block around <=4 MiB
        # (f32 accounting) so double-buffered in+out plus f32 temporaries
        # stay well inside VMEM on all chips (incl. v7x's 64 MiB).
        target_elems = (4 * 1024 * 1024) // 4
        gt_cap = max(1, target_elems // (Cg * HW))
        if N < 2:
            # Guarantee >=2 grid programs so both v7x TensorCores get work.
            gt_cap = min(gt_cap, max(1, G // 2))
        Gt = _largest_divisor_leq(G, gt_cap)
        # NOTE: if a single group's slab (Cg*HW*4 B) ever exceeded the VMEM
        # budget, an HW-tiled two-pass (stats then normalize) variant would
        # be needed; typical conv shapes never hit this.

        block_f32 = Gt * Cg * HW * 4
        vmem_limit = int(min(64 * 1024 * 1024,
                             max(32 * 1024 * 1024, 10 * block_f32)))

        kernel = functools.partial(_gbn_kernel_grouped, eps=eps,
                                   inv_l=inv_l, inv_lm1=inv_lm1)
        out = pl.pallas_call(
            kernel,
            out_shape=jax.ShapeDtypeStruct((N, G, Cg, HW), x.dtype),
            grid_spec=pltpu.PrefetchScalarGridSpec(
                num_scalar_prefetch=0,
                grid=(N, G // Gt),
                in_specs=[
                    pl.BlockSpec((1, Gt, Cg, HW), lambda n, g: (n, g, 0, 0)),
                    pl.BlockSpec((1, Gt, Cg, 1), lambda n, g: (0, g, 0, 0)),
                    pl.BlockSpec((1, Gt, Cg, 1), lambda n, g: (0, g, 0, 0)),
                ],
                out_specs=pl.BlockSpec((1, Gt, Cg, HW),
                                       lambda n, g: (n, g, 0, 0)),
            ),
            compiler_params=pltpu.CompilerParams(
                dimension_semantics=("parallel", "parallel"),
                vmem_limit_bytes=vmem_limit),
        )(x_g, gamma_g, beta_g)
        return out.reshape(N, C, H, W)

    # -------- fallback: groups straddle channels (C % G != 0) --------
    # Matches torch's .view(N, G, -1); gamma/beta must be broadcast to the
    # flattened group layout here (exotic case only).
    x_g = x.reshape(N, G, L)
    gamma_flat = jnp.broadcast_to(gamma.reshape(C, 1, 1),
                                  (C, H, W)).reshape(1, G, L)
    beta_flat = jnp.broadcast_to(beta.reshape(C, 1, 1),
                                 (C, H, W)).reshape(1, G, L)

    slab_f32 = G * L * 4
    vmem_limit = int(min(64 * 1024 * 1024,
                         max(32 * 1024 * 1024, 12 * slab_f32)))

    kernel = functools.partial(_gbn_kernel_flat, eps=eps,
                               inv_l=inv_l, inv_lm1=inv_lm1)
    out = pl.pallas_call(
        kernel,
        out_shape=jax.ShapeDtypeStruct((N, G, L), x.dtype),
        grid_spec=pltpu.PrefetchScalarGridSpec(
            num_scalar_prefetch=0,
            grid=(N,),
            in_specs=[
                pl.BlockSpec((1, G, L), lambda n: (n, 0, 0)),
                pl.BlockSpec((1, G, L), lambda n: (0, 0, 0)),
                pl.BlockSpec((1, G, L), lambda n: (0, 0, 0)),
            ],
            out_specs=pl.BlockSpec((1, G, L), lambda n: (n, 0, 0)),
        ),
        compiler_params=pltpu.CompilerParams(
            dimension_semantics=("parallel",),
            vmem_limit_bytes=vmem_limit),
    )(x_g, gamma_flat, beta_flat)
    return out.reshape(N, C, H, W)


if __name__ == "__main__":
    key = jax.random.PRNGKey(0)

    def ref_group_bn(x, gamma, beta, group_num, eps):
        # Pure-JAX reference with torch semantics (unbiased std, eps on std).
        N, C, H, W = x.shape
        xg = x.astype(jnp.float32).reshape(N, group_num, -1)
        L = xg.shape[-1]
        mean = xg.mean(axis=2, keepdims=True)
        std = jnp.sqrt(((xg - mean) ** 2).sum(axis=2, keepdims=True) / (L - 1))
        y = ((xg - mean) / (std + eps)).reshape(N, C, H, W)
        return y * gamma.astype(jnp.float32) + beta.astype(jnp.float32)

    # ---- Test 1: optimized per-channel path (C % G == 0), f32 I/O ----
    N, C, H, W, G = 2, 32, 16, 16, 16
    k1, k2, k3 = jax.random.split(key, 3)
    x = jax.random.normal(k1, (N, C, H, W), dtype=jnp.float32)
    gamma = 1.0 + 0.1 * jax.random.normal(k2, (C, 1, 1), dtype=jnp.float32)
    beta = 0.1 * jax.random.normal(k3, (C, 1, 1), dtype=jnp.float32)
    out = jax.block_until_ready(group_batchnorm2d(x, gamma, beta, group_num=G))
    ref = ref_group_bn(x, gamma, beta, G, 1e-10)
    assert out.shape == (N, C, H, W)
    # Tolerance accounts for the in-kernel approximate reciprocal.
    assert jnp.max(jnp.abs(out - ref)) < 5e-2, "mismatch (grouped path)"

    # ---- Test 2: fallback path (C % G != 0, groups straddle channels) ----
    N2, C2, H2, W2, G2 = 2, 4, 16, 16, 16
    x2 = jax.random.normal(k1, (N2, C2, H2, W2), dtype=jnp.float32)
    gamma2 = jnp.ones((C2, 1, 1), dtype=jnp.float32)
    beta2 = jnp.zeros((C2, 1, 1), dtype=jnp.float32)
    out2 = jax.block_until_ready(
        group_batchnorm2d(x2, gamma2, beta2, group_num=G2))
    ref2 = ref_group_bn(x2, gamma2, beta2, G2, 1e-10)
    assert jnp.max(jnp.abs(out2 - ref2)) < 5e-2, "mismatch (fallback path)"

    # ---- Test 3: bf16 I/O path (stats stay f32 in-kernel) ----
    xb = x.astype(jnp.bfloat16)
    outb = jax.block_until_ready(group_batchnorm2d(xb, gamma, beta, group_num=G))
    refb = ref_group_bn(xb.astype(jnp.float32), gamma, beta, G, 1e-10)
    assert outb.dtype == jnp.bfloat16
    assert jnp.max(jnp.abs(outb.astype(jnp.float32) - refb)) < 1e-1, \
        "mismatch (bf16 path)"

    print("KERNEL_OK")
</pallas_src>

<mosaic_0001>
module attributes {stable_mosaic.version = 11 : i64} {
  func.func @_gbn_kernel_grouped(%arg0: i32, %arg1: i32, %arg2: memref<1x16x2x256xf32, #tpu.memory_space<vmem>>, %arg3: memref<1x16x2x1xf32, #tpu.memory_space<vmem>>, %arg4: memref<1x16x2x1xf32, #tpu.memory_space<vmem>>, %arg5: memref<1x16x2x256xf32, #tpu.memory_space<vmem>>) attributes {dimension_semantics = [#tpu.dimension_semantics<parallel>, #tpu.dimension_semantics<parallel>], iteration_bounds = array<i64: 2, 1>, scalar_prefetch = 0 : i64, scratch_operands = 0 : i64, tpu.core_type = #tpu.core_type<tc>, window_params = [{transform_indices = @transform_0, window_bounds = array<i64: 1, 16, 2, 256>}, {transform_indices = @transform_1, window_bounds = array<i64: 1, 16, 2, 1>}, {transform_indices = @transform_2, window_bounds = array<i64: 1, 16, 2, 1>}, {transform_indices = @transform_3, window_bounds = array<i64: 1, 16, 2, 256>}]} {
    %c0 = arith.constant 0 : index
    %c0_0 = arith.constant 0 : index
    %c0_1 = arith.constant 0 : index
    %c0_2 = arith.constant 0 : index
    %0 = vector.load %arg2[%c0, %c0_0, %c0_1, %c0_2] : memref<1x16x2x256xf32, #tpu.memory_space<vmem>>, vector<1x16x2x256xf32>
    %cst = arith.constant dense<0.000000e+00> : vector<1x16x2xf32>
    %1 = vector.multi_reduction <add>, %0, %cst [3] : vector<1x16x2x256xf32> to vector<1x16x2xf32>
    %2 = vector.shape_cast %1 : vector<1x16x2xf32> to vector<1x16x2x1xf32>
    %cst_3 = arith.constant dense<0.000000e+00> : vector<1x16x1xf32>
    %3 = vector.multi_reduction <add>, %2, %cst_3 [2] : vector<1x16x2x1xf32> to vector<1x16x1xf32>
    %4 = vector.shape_cast %3 : vector<1x16x1xf32> to vector<1x16x1x1xf32>
    %5 = arith.mulf %0, %0 : vector<1x16x2x256xf32>
    %cst_4 = arith.constant dense<0.000000e+00> : vector<1x16x2xf32>
    %6 = vector.multi_reduction <add>, %5, %cst_4 [3] : vector<1x16x2x256xf32> to vector<1x16x2xf32>
    %7 = vector.shape_cast %6 : vector<1x16x2xf32> to vector<1x16x2x1xf32>
    %cst_5 = arith.constant dense<0.000000e+00> : vector<1x16x1xf32>
    %8 = vector.multi_reduction <add>, %7, %cst_5 [2] : vector<1x16x2x1xf32> to vector<1x16x1xf32>
    %9 = vector.shape_cast %8 : vector<1x16x1xf32> to vector<1x16x1x1xf32>
    %cst_6 = arith.constant 0.001953125 : f32
    %10 = vector.broadcast %cst_6 : f32 to vector<1x16x1x1xf32>
    %11 = arith.mulf %4, %10 : vector<1x16x1x1xf32>
    %12 = arith.mulf %4, %11 : vector<1x16x1x1xf32>
    %13 = arith.subf %9, %12 : vector<1x16x1x1xf32>
    %cst_7 = arith.constant 0.00195694715 : f32
    %14 = vector.broadcast %cst_7 : f32 to vector<1x16x1x1xf32>
    %15 = arith.mulf %13, %14 : vector<1x16x1x1xf32>
    %cst_8 = arith.constant 0.000000e+00 : f32
    %16 = vector.broadcast %cst_8 : f32 to vector<1x16x1x1xf32>
    %17 = arith.maximumf %15, %16 : vector<1x16x1x1xf32>
    %18 = math.sqrt %17 : vector<1x16x1x1xf32>
    %cst_9 = arith.constant 1.000000e-10 : f32
    %19 = vector.broadcast %cst_9 : f32 to vector<1x16x1x1xf32>
    %20 = arith.addf %18, %19 : vector<1x16x1x1xf32>
    %21 = tpu.reciprocal %20 {approx = true} : vector<1x16x1x1xf32> -> vector<1x16x1x1xf32>
    %c0_10 = arith.constant 0 : index
    %c0_11 = arith.constant 0 : index
    %c0_12 = arith.constant 0 : index
    %c0_13 = arith.constant 0 : index
    %22 = vector.load %arg3[%c0_10, %c0_11, %c0_12, %c0_13] : memref<1x16x2x1xf32, #tpu.memory_space<vmem>>, vector<1x16x2x1xf32>
    %c0_14 = arith.constant 0 : index
    %c0_15 = arith.constant 0 : index
    %c0_16 = arith.constant 0 : index
    %c0_17 = arith.constant 0 : index
    %23 = vector.load %arg4[%c0_14, %c0_15, %c0_16, %c0_17] : memref<1x16x2x1xf32, #tpu.memory_space<vmem>>, vector<1x16x2x1xf32>
    %24 = vector.broadcast %21 : vector<1x16x1x1xf32> to vector<1x16x2x1xf32>
    %25 = arith.mulf %22, %24 : vector<1x16x2x1xf32>
    %26 = vector.broadcast %11 : vector<1x16x1x1xf32> to vector<1x16x2x1xf32>
    %27 = arith.mulf %26, %25 : vector<1x16x2x1xf32>
    %28 = arith.subf %23, %27 : vector<1x16x2x1xf32>
    %29 = vector.broadcast %25 : vector<1x16x2x1xf32> to vector<1x16x2x256xf32>
    %30 = arith.mulf %0, %29 : vector<1x16x2x256xf32>
    %31 = vector.broadcast %28 : vector<1x16x2x1xf32> to vector<1x16x2x256xf32>
    %32 = arith.addf %30, %31 : vector<1x16x2x256xf32>
    %c0_18 = arith.constant 0 : index
    %c0_19 = arith.constant 0 : index
    %c0_20 = arith.constant 0 : index
    %c0_21 = arith.constant 0 : index
    %33 = vector.load %arg5[%c0_18, %c0_19, %c0_20, %c0_21] : memref<1x16x2x256xf32, #tpu.memory_space<vmem>>, vector<1x16x2x256xf32>
    tpu.vector_store %arg5[%c0_18, %c0_19, %c0_20, %c0_21], %32 {strides = array<i32>} : memref<1x16x2x256xf32, #tpu.memory_space<vmem>>, vector<1x16x2x256xf32>,
    return
  }
  func.func @transform_0(%arg0: i32, %arg1: i32) -> (i32, i32, i32, i32) {
    %c0_i32 = arith.constant 0 : i32
    %c0_i32_0 = arith.constant 0 : i32
    %c0_i32_1 = arith.constant 0 : i32
    return %arg0, %arg1, %c0_i32, %c0_i32_0 : i32, i32, i32, i32
  }
  func.func @transform_1(%arg0: i32, %arg1: i32) -> (i32, i32, i32, i32) {
    %c0_i32 = arith.constant 0 : i32
    %c0_i32_0 = arith.constant 0 : i32
    %c0_i32_1 = arith.constant 0 : i32
    %c0_i32_2 = arith.constant 0 : i32
    return %c0_i32, %arg1, %c0_i32_0, %c0_i32_1 : i32, i32, i32, i32
  }
  func.func @transform_2(%arg0: i32, %arg1: i32) -> (i32, i32, i32, i32) {
    %c0_i32 = arith.constant 0 : i32
    %c0_i32_0 = arith.constant 0 : i32
    %c0_i32_1 = arith.constant 0 : i32
    %c0_i32_2 = arith.constant 0 : i32
    return %c0_i32, %arg1, %c0_i32_0, %c0_i32_1 : i32, i32, i32, i32
  }
  func.func @transform_3(%arg0: i32, %arg1: i32) -> (i32, i32, i32, i32) {
    %c0_i32 = arith.constant 0 : i32
    %c0_i32_0 = arith.constant 0 : i32
    %c0_i32_1 = arith.constant 0 : i32
    return %arg0, %arg1, %c0_i32, %c0_i32_0 : i32, i32, i32, i32
  }
}

</mosaic_0001>

<bundles_post_ra>
// kernel: tpu_custom_call.1
= control target key start
LH: loop header
LB: loop body
LE: loop exit
PB: predicated region body
PF: predicated region fallthrough
CT: control target
= control target key end

     0   :  { %8 = vsyncpa [#allocation3], 0  ;;  %s3118_s0 = inlined_call_operand.hbm [shape: f32[2,16,2,256], index: 0, kind: input, shape index: {}]   ;;  %s3119_s1 = inlined_call_operand.vmem [shape: f32[1,16,2,1], index: 1, kind: input, shape index: {}]   ;;  %s3120_s2 = inlined_call_operand.vmem [shape: f32[1,16,2,1], index: 2, kind: input, shape index: {}]   ;;  %s3121_s3 = inlined_call_operand.hbm [shape: f32[2,16,2,256], index: 3, kind: output, shape index: {}]  }
   0x1   :  { %10 = vsyncpa [#allocation3 + $0x1], 0 }
   0x2   :  { %11 = vsyncpa [#allocation4], 0 }
   0x3   :  { %13 = vsyncpa [#allocation4 + $0x1], 0  ;;  %s2206_s12 = smov 0   ;;  %s2208_s13 = smov 0  }
   0x4   :  { %s2210_s14 = smov 0   ;;  %s2212_s15 = smov 0  }
   0x5   :  { %s2214_s16 = smov 0   ;;  %s2216_s17 = smov 0  }
   0x6 LB: > { %s1893_s18 = sadd.s32 4294967295, %s2175_s17   ;;  %s1894_s19 = sadd.s32 4294967294, %s2175_s17   ;;  %s2175_s17 = sphi %s2216_s17, %s19_s17   ;;  %s2171_s16 = sphi %s2214_s16, %s3136_s16   ;;  %s2167_s15 = sphi %s2212_s15, %s3135_s15   ;;  %s2163_s14 = sphi %s2210_s14, %s3134_s14   ;;  %s2159_s13 = sphi %s2208_s13, %s3133_s13   ;;  %s2155_s12 = sphi %s2206_s12, %s3132_s12  }
   0x7   : > { %s31_s20 = sadd.s32 1, %s2171_s16  ;;  %s40_s21 = sadd.s32 1, %s2163_s14 }
   0x8   : > { %p33_p0 = scmp.ge.s32.totalorder %s31_s20, 2  ;;  %p47_p1 = scmp.ne.s32.totalorder %s2163_s14, %s2159_s13 }
   0x9   : > { %p48_p2 = scmp.eq.s32.totalorder %s2175_s17, 0  ;;  %p53_p3 = scmp.ne.s32.totalorder %s2159_s13, %s2155_s12 }
   0xa   : > { %s3138_s20 = smov (%p33_p0, %s31_s20), 0  ;;  %p54_p5 = scmp.eq.s32.totalorder %s1893_s18, 0 }
   0xb   : > { %p2247_p4 = por %p48_p2, %p47_p1  ;;  %s35_s23 = ssub.s32 %s2171_s16, %s3138_s20 }
   0xc   : > { %p131_p6 = scmp.eq.s32.totalorder %s1893_s18, 1  ;;  %p38_p7 = scmp.eq.s32.totalorder %s35_s23, 0 }
   0xd   : > { %p2253_p8 = por %p54_p5, %p53_p3  ;;  %p137_p10 = scmp.eq.s32.totalorder %s1894_s19, 1 }
   0xe   : > { %p2257_p9 = por %p131_p6, %p47_p1  ;;  %p1924_p13 = scmp.lt.s32.totalorder %s2175_s17, 2 }
   0xf   : > { %s2262_s26 = scalar_select %p38_p7, %s2163_s14, %s40_s21  }
  0x10   : > { %s3125_s25 = scalar_select %p2257_p9, 1, 0 }
  0x11   : > { %p2264_p11 = por %p137_p10, %p53_p3  ;;  %s175_s28 = sand.u32 1, %s2163_s14  }
  0x12   : > { %s1899_s29 = sshll.u32 %s175_s28, 6  ;;  %s1910_s30 = sshll.u32 %s2171_s16, 10 }
  0x13   : > { %s3126_s27 = scalar_select %p2264_p11, 1, 0 }
  0x14   : > { %s2275_s6 = scalar_lea.hbm %s3118_s0, %s1910_s30  ;;  %s179_s7 = scalar_lea.vmem [#allocation2], %s1899_s29 }
  0x15   : > { %s189_s8 = sshll.u32 %s179_s7, 4  ;;  %p2281_p0 = pnand %p1924_p13, %p2247_p4  ;;  %s2277_s8 = int_to_ptr.vmem [resolvable:$true] %s189_s8 }
  0x16   : > { %s2286_s10 = scalar_lea.sflag [#allocation3], %s175_s28  ;;  %s2063_s11 = scalar_lea.hbm %s2275_s6, 1024 }
  0x17   : > { %p2064_p2 = scmp.ne.s32.totalorder %s2275_s6, %s2063_s11  ;;  %p2065_p3 = pneg %p2281_p0 }
  0x18   : > { %s2068_s21 = scalar_lea.hbm %s3118_s0, 2048  ;;  %p2069_p4 = scmp.lt.u32.totalorder %s2275_s6, %s3118_s0 }
  0x19   : > { %p2066_p5 = pnand %p2065_p3, %p2064_p2  ;;  %p2070_p7 = scmp.lt.u32.totalorder %s2068_s21, %s2063_s11 }
  0x1a   : > { %p2072_p13 = scmp.lt.u32.totalorder %s2063_s11, %s2275_s6 }
  0x1b   : > { %p2067_p6 = pneg %p2066_p5  ;;  %p2071_p10 = por %p2070_p7, %p2069_p4 }
  0x1d   : > { %p2073_p12 = por %p2072_p13, %p2071_p10 }
  0x1f   : > { %p2074_p1 = pnand %p2073_p12, %p2067_p6 }
  0x21   : > { %2077 = shalt.err (!%p2074_p1)
}
  0x22   : > { %s2078_s28 = scalar_lea.vmem %s2277_s8, 1024  ;;  %s2177_s29 = smov [#allocation2]  }
  0x23   : > { %p2079_p2 = scmp.ne.s32.totalorder %s2277_s8, %s2078_s28  ;;  %s2083_s30 = sshll.u32 %s2177_s29, 4  ;;  %s2084_s30 = int_to_ptr.vmem [resolvable:$false] %s2083_s30 }
  0x24   : > { %s2085_s4 = scalar_lea.vmem %s2084_s30, 2048  ;;  %p2086_p9 = scmp.lt.s32.totalorder %s2277_s8, %s2084_s30 }
  0x25   : > { %p2081_p5 = pnand %p2079_p2, %p2065_p3  ;;  %p2087_p4 = scmp.lt.s32.totalorder %s2085_s4, %s2078_s28 }
  0x27   : > { %p2082_p11 = pneg %p2081_p5  ;;  %p2088_p7 = por %p2087_p4, %p2086_p9 }
  0x29   : > { %p2089_p10 = pnand %p2088_p7, %p2082_p11 }
  0x2b   : > { %2092 = shalt.err (!%p2089_p10)
}
  0x2c   : > { %s2178_s5 = smov 64   ;;  %s2179_s7 = smov 4  }
  0x2d   : > { %1919 = dma.hbm_to_vmem [thread:$0]  (!%p2281_p0), %s2275_s6, 1024, %s2277_s8, %s2286_s10, %s2178_s5, %s2178_s5, %s2179_s7  }
  0x2e   : > { %p197_p12 = scmp.lt.s32.totalorder %s2175_s17, 3  ;;  %p3128_p1 = scmp.ge.s32.totalorder %s2175_s17, 1 }
  0x30   : > { %p198_p3 = pnand %p3128_p1, %p197_p12 }
  0x31   : > { %s2318_s11 = sand.u32 (!%p198_p3), 1, %s2159_s13  }
  0x32   : > { %201 = sbr.rel (%p198_p3) target bundleno = 536 (0x218), region = 32  ;;  %s1903_s18 = sshll.u32 (!%p198_p3), %s2318_s11, 6 }
  0x33   : > { %s204_s19 = scalar_lea.sflag (!%p198_p3), [#allocation3], %s2318_s11  ;;  %s2324_s21 = scalar_lea.vmem (!%p198_p3), [#allocation2], %s1903_s18 }
  0x39   : > { %2146 = dma.done.wait (%p2253_p8), %s204_s19, 1024  }
  0x3a   : > { %2148 = vsyncadd (%p2253_p8), %s204_s19, 4294966272  ;;  %v289_v0 = vlaneseq  ;;  %v2180_v1 = vmov 1983009808   ;;  %vm446_vm0 = vcmask 1041408   ;;  %v2336_v6 = vld [vmem:[%s2324_s21 + $0x8] sm:$0xf] }
  0x3b   : > { %v287_v2 = vunpack.c.l.s4 %v2180_v1  ;;  %v2339_v7 = vld [vmem:[%s2324_s21] sm:$0xf]  ;;  %v2342_v8 = vld [vmem:[%s2324_s21 + $0xc] sm:$0xf]  ;;  %v2351_v12 = vld [vmem:[%s2324_s21 + $0x4] sm:$0xf] }
  0x3c   : > { %v2330_v3 = vshrl.u32 %v289_v0, 7  ;;  %v2354_v13 = vld [vmem:[%s2324_s21 + $0x14] sm:$0xf]  ;;  %v2357_v14 = vld [vmem:[%s2324_s21 + $0x10] sm:$0xf]  ;;  %s2989_s29 = scalar_lea.vmem [#allocation5], %s1903_s18 }
  0x3d   : > { %v288_v4 = vunpack.c.0.s8 %v287_v2  ;;  %v2369_v25 = vld [vmem:[%s2324_s21 + $0x1c] sm:$0xf]  ;;  %v2375_v30 = vld [vmem:[%s2324_s21 + $0x18] sm:$0xf]  ;;  %v2380_v35 = vld [vmem:[%s2324_s21 + $0x24] sm:$0xf] }
  0x3e   : > { %v2383_v36 = vld [vmem:[%s2324_s21 + $0x20] sm:$0xf]  ;;  %v2392_v44 = vld [vmem:[%s2324_s21 + $0x2c] sm:$0xf]  ;;  %v2403_v56 = vld [vmem:[%s2324_s21 + $0x28] sm:$0xf] }
  0x3f   : > { %v2333_v5 = vsub.s32 %v288_v4, %v2330_v3  ;;  %v2410_v61 = vld [vmem:[%s2324_s21 + $0x34] sm:$0xf]  ;;  %v2413_v62 = vld [vmem:[%s2324_s21 + $0x30] sm:$0xf]  ;;  %s1911_s18 = sshll.u32 %s2167_s15, 10  ;;  %s1776_s30 = sshll.u32 %s2989_s29, 4  ;;  %s3068_s30 = int_to_ptr.vmem [resolvable:$true] %s1776_s30 }
  0x40   : > { %s3066_s7 = scalar_lea.hbm %s3121_s3, %s1911_s18  ;;  %s1760_s15 = scalar_lea.sflag [#allocation4], %s2318_s11 }
  0x41   : > { %v308_v9 = vrot.slane %v2336_v6, %v2333_v5  ;;  %v292_v10 = vrot.slane %v2339_v7, %v2333_v5  ;;  %v316_v11 = vrot.slane %v2342_v8, %v2333_v5  ;;  %v300_v15 = vrot.slane %v2351_v12, %v2333_v5  ;;  %s2093_s19 = scalar_lea.vmem %s3068_s30, 1024  ;;  %p3129_p9 = scmp.ne.s32.totalorder %s3125_s25, 0 }
  0x42   : > { %v332_v16 = vrot.slane %v2354_v13, %v2333_v5  ;;  %v324_v17 = vrot.slane %v2357_v14, %v2333_v5  ;;  %v348_v42 = vrot.slane %v2369_v25, %v2333_v5  ;;  %v340_v43 = vrot.slane %v2375_v30, %v2333_v5  ;;  %p2094_p8 = scmp.ne.s32.totalorder %s3068_s30, %s2093_s19 }
  0x43   : > { %v309_v18 = vcombine.high %v308_v9, %v308_v9  ;;  %v457_v19 = vsel %vm446_vm0, %v308_v9, 0.0  ;;  %v293_v20 = vcombine.high %v292_v10, %v292_v10  ;;  %v447_v21 = vsel %vm446_vm0, %v292_v10, 0.0 }
  0x44   : > { %v317_v22 = vcombine.high %v316_v11, %v316_v11  ;;  %v462_v23 = vsel %vm446_vm0, %v316_v11, 0.0  ;;  %v301_v24 = vcombine.high %v300_v15, %v300_v15  ;;  %v452_v28 = vsel %vm446_vm0, %v300_v15, 0.0  ;;  %p2095_p11 = pnand %p2094_p8, %p3129_p9 }
  0x45   : > { %v458_v26 = vsel %vm446_vm0, %v309_v18, 0.0  ;;  %v448_v27 = vsel %vm446_vm0, %v293_v20, 0.0  ;;  %v333_v29 = vcombine.high %v332_v16, %v332_v16  ;;  %v472_v38 = vsel %vm446_vm0, %v332_v16, 0.0  ;;  %v2426_v18 = vld [vmem:[%s2324_s21 + $0x3c] sm:$0xf] }
  0x46   : > { %v459_v31 = vadd.f32 %v458_v26, %v457_v19  ;;  %v449_v32 = vadd.f32 %v448_v27, %v447_v21  ;;  %v463_v33 = vsel %vm446_vm0, %v317_v22, 0.0  ;;  %v453_v34 = vsel %vm446_vm0, %v301_v24, 0.0  ;;  %v2429_v19 = vld [vmem:[%s2324_s21 + $0x38] sm:$0xf]  ;;  %p2096_p0 = pneg %p2095_p11 }
  0x47   : > { %v464_v37 = vadd.f32 %v463_v33, %v462_v23  ;;  %v325_v39 = vcombine.high %v324_v17, %v324_v17  ;;  %v454_v40 = vadd.f32 %v453_v34, %v452_v28  ;;  %v473_v41 = vsel %vm446_vm0, %v333_v29, 0.0 }
  0x48   : > { %460 = vadd.xlane.f32.xlu1 %v459_v31  ;;  %450 = vadd.xlane.f32.xlu0 %v449_v32  ;;  %v467_v45 = vsel %vm446_vm0, %v324_v17, 0.0  ;;  %v364_v47 = vrot.slane %v2380_v35, %v2333_v5  ;;  %v356_v48 = vrot.slane %v2383_v36, %v2333_v5  ;;  %v349_v49 = vcombine.high %v348_v42, %v348_v42 }
  0x49   : > { %v468_v46 = vsel %vm446_vm0, %v325_v39, 0.0  ;;  %v341_v50 = vcombine.high %v340_v43, %v340_v43  ;;  %v474_v51 = vadd.f32 %v473_v41, %v472_v38  ;;  %v380_v52 = vrot.slane %v2392_v44, %v2333_v5 }
  0x4a   : > { %v469_v53 = vadd.f32 %v468_v46, %v467_v45  ;;  %v365_v54 = vcombine.high %v364_v47, %v364_v47  ;;  %v357_v55 = vcombine.high %v356_v48, %v356_v48  ;;  %v482_v57 = vsel %vm446_vm0, %v348_v42, 0.0 }
  0x4b   : > { %v483_v58 = vsel %vm446_vm0, %v349_v49, 0.0  ;;  %v477_v59 = vsel %vm446_vm0, %v340_v43, 0.0  ;;  %v478_v60 = vsel %vm446_vm0, %v341_v50, 0.0  ;;  %v492_v63 = vsel %vm446_vm0, %v364_v47, 0.0 }
  0x4c   : > { %465 = vadd.xlane.f32.xlu1 %v464_v37  ;;  %455 = vadd.xlane.f32.xlu0 %v454_v40  ;;  %v487_v0 = vsel %vm446_vm0, %v356_v48, 0.0  ;;  %v381_v1 = vcombine.high %v380_v52, %v380_v52  ;;  %v372_v2 = vrot.slane %v2403_v56, %v2333_v5  ;;  %v484_v4 = vadd.f32 %v483_v58, %v482_v57 }
  0x4d   : > { %v479_v9 = vadd.f32 %v478_v60, %v477_v59  ;;  %v493_v10 = vsel %vm446_vm0, %v365_v54, 0.0  ;;  %v488_v11 = vsel %vm446_vm0, %v357_v55, 0.0  ;;  %v396_v16 = vrot.slane %v2410_v61, %v2333_v5 }
  0x4e   : > { %v373_v15 = vcombine.high %v372_v2, %v372_v2  ;;  %v388_v17 = vrot.slane %v2413_v62, %v2333_v5  ;;  %v640_v20 = vmul.f32 %v2351_v12, %v2351_v12  ;;  %v494_v21 = vadd.f32 %v493_v10, %v492_v63 }
  0x4f   : > { %v489_v22 = vadd.f32 %v488_v11, %v487_v0  ;;  %v639_v23 = vmul.f32 %v2339_v7, %v2339_v7  ;;  %v502_v24 = vsel %vm446_vm0, %v380_v52, 0.0  ;;  %v503_v26 = vsel %vm446_vm0, %v381_v1, 0.0 }
  0x50   : > { %475 = vadd.xlane.f32.xlu1 %v474_v51  ;;  %470 = vadd.xlane.f32.xlu0 %v469_v53  ;;  %v412_v27 = vrot.slane %v2426_v18, %v2333_v5  ;;  %v404_v28 = vrot.slane %v2429_v19, %v2333_v5  ;;  %v497_v29 = vsel %vm446_vm0, %v372_v2, 0.0  ;;  %v498_v12 = vsel %vm446_vm0, %v373_v15, 0.0 }
  0x51   : > { %v397_v31 = vcombine.high %v396_v16, %v396_v16  ;;  %v389_v32 = vcombine.high %v388_v17, %v388_v17  ;;  %v685_v7 = vrot.slane %v640_v20, %v2333_v5  ;;  %v504_v33 = vadd.f32 %v503_v26, %v502_v24 }
  0x52   : > { %v512_v34 = vsel %vm446_vm0, %v396_v16, 0.0  ;;  %v642_v37 = vmul.f32 %v2342_v8, %v2342_v8  ;;  %v499_v38 = vadd.f32 %v498_v12, %v497_v29  ;;  %v507_v39 = vsel %vm446_vm0, %v388_v17, 0.0 }
  0x53   : > { %v413_v40 = vcombine.high %v412_v27, %v412_v27  ;;  %v641_v41 = vmul.f32 %v2336_v6, %v2336_v6  ;;  %v513_v42 = vsel %vm446_vm0, %v397_v31, 0.0  ;;  %v508_v43 = vsel %vm446_vm0, %v389_v32, 0.0 }
  0x54   : > { %485 = vadd.xlane.f32.xlu1 %v484_v4  ;;  %480 = vadd.xlane.f32.xlu0 %v479_v9  ;;  %v405_v45 = vcombine.high %v404_v28, %v404_v28  ;;  %v677_v46 = vrot.slane %v639_v23, %v2333_v5  ;;  %v686_v47 = vcombine.high %v685_v7, %v685_v7  ;;  %v522_v51 = vsel %vm446_vm0, %v412_v27, 0.0 }
  0x55   : > { %v644_v8 = vmul.f32 %v2354_v13, %v2354_v13  ;;  %v701_v48 = vrot.slane %v642_v37, %v2333_v5  ;;  %v643_v49 = vmul.f32 %v2357_v14, %v2357_v14  ;;  %v514_v50 = vadd.f32 %v513_v42, %v512_v34 }
  0x56   : > { %v509_v6 = vadd.f32 %v508_v43, %v507_v39  ;;  %v693_v52 = vrot.slane %v641_v41, %v2333_v5  ;;  %v523_v53 = vsel %vm446_vm0, %v413_v40, 0.0  ;;  %v517_v54 = vsel %vm446_vm0, %v404_v28, 0.0 }
  0x57   : > { %v518_v55 = vsel %vm446_vm0, %v405_v45, 0.0  ;;  %v678_v13 = vcombine.high %v677_v46, %v677_v46  ;;  %v836_v57 = vsel %vm446_vm0, %v685_v7, 0.0  ;;  %v837_v58 = vsel %vm446_vm0, %v686_v47, 0.0 }
  0x58   : > { %495 = vadd.xlane.f32.xlu1 %v494_v21  ;;  %490 = vadd.xlane.f32.xlu0 %v489_v22  ;;  %v717_v14 = vrot.slane %v644_v8, %v2333_v5  ;;  %v702_v59 = vcombine.high %v701_v48, %v701_v48  ;;  %v709_v60 = vrot.slane %v643_v49, %v2333_v5  ;;  %v831_v9 = vsel %vm446_vm0, %v677_v46, 0.0 }
  0x59   : > { %v646_v63 = vmul.f32 %v2369_v25, %v2369_v25  ;;  %v645_v0 = vmul.f32 %v2375_v30, %v2375_v30  ;;  %v524_v1 = vadd.f32 %v523_v53, %v522_v51  ;;  %v519_v2 = vadd.f32 %v518_v55, %v517_v54 }
  0x5a   : > { %v694_v4 = vcombine.high %v693_v52, %v693_v52  ;;  %v832_v10 = vsel %vm446_vm0, %v678_v13, 0.0  ;;  %v838_v11 = vadd.f32 %v837_v58, %v836_v57  ;;  %v846_v15 = vsel %vm446_vm0, %v701_v48, 0.0 }
  0x5b   : > { %v718_v16 = vcombine.high %v717_v14, %v717_v14  ;;  %v847_v17 = vsel %vm446_vm0, %v702_v59, 0.0  ;;  %v710_v20 = vcombine.high %v709_v60, %v709_v60  ;;  %v733_v25 = vrot.slane %v646_v63, %v2333_v5 }
  0x5c   : > { %505 = vadd.xlane.f32.xlu1 %v504_v33  ;;  %500 = vadd.xlane.f32.xlu0 %v499_v38  ;;  %v725_v30 = vrot.slane %v645_v0, %v2333_v5  ;;  %v833_v21 = vadd.f32 %v832_v10, %v831_v9  ;;  %v841_v22 = vsel %vm446_vm0, %v693_v52, 0.0  ;;  %v842_v23 = vsel %vm446_vm0, %v694_v4, 0.0 }
  0x5d   : > { %v648_v24 = vmul.f32 %v2380_v35, %v2380_v35  ;;  %v647_v26 = vmul.f32 %v2383_v36, %v2383_v36  ;;  %v848_v27 = vadd.f32 %v847_v17, %v846_v15  ;;  %v856_v28 = vsel %vm446_vm0, %v717_v14, 0.0 }
  0x5e   : > { %v857_v29 = vsel %vm446_vm0, %v718_v16, 0.0  ;;  %v851_v12 = vsel %vm446_vm0, %v709_v60, 0.0  ;;  %v843_v31 = vadd.f32 %v842_v23, %v841_v22  ;;  %v852_v32 = vsel %vm446_vm0, %v710_v20, 0.0 }
  0x5f   : > { %v734_v7 = vcombine.high %v733_v25, %v733_v25  ;;  %v726_v33 = vcombine.high %v725_v30, %v725_v30  ;;  %v749_v34 = vrot.slane %v648_v24, %v2333_v5  ;;  %v650_v35 = vmul.f32 %v2392_v44, %v2392_v44 }
  0x60   : > { %515 = vadd.xlane.f32.xlu1 %v514_v50  ;;  %510 = vadd.xlane.f32.xlu0 %v509_v6  ;;  %v649_v36 = vmul.f32 %v2403_v56, %v2403_v56  ;;  %v741_v37 = vrot.slane %v647_v26, %v2333_v5  ;;  %v858_v38 = vadd.f32 %v857_v29, %v856_v28  ;;  %v866_v40 = vsel %vm446_vm0, %v733_v25, 0.0 }
  0x61   : > { %v853_v39 = vadd.f32 %v852_v32, %v851_v12  ;;  %v867_v41 = vsel %vm446_vm0, %v734_v7, 0.0  ;;  %v861_v42 = vsel %vm446_vm0, %v725_v30, 0.0  ;;  %v652_v43 = vmul.f32 %v2410_v61, %v2410_v61 }
  0x62   : > { %v862_v44 = vsel %vm446_vm0, %v726_v33, 0.0  ;;  %v750_v45 = vcombine.high %v749_v34, %v749_v34  ;;  %v765_v56 = vrot.slane %v650_v35, %v2333_v5  ;;  %v757_v46 = vrot.slane %v649_v36, %v2333_v5 }
  0x63   : > { %v742_v47 = vcombine.high %v741_v37, %v741_v37  ;;  %v651_v8 = vmul.f32 %v2413_v62, %v2413_v62  ;;  %v868_v48 = vadd.f32 %v867_v41, %v866_v40  ;;  %v863_v49 = vadd.f32 %v862_v44, %v861_v42 }
  0x64   : > { %525 = vadd.xlane.f32.xlu1 %v524_v1  ;;  %520 = vadd.xlane.f32.xlu0 %v519_v2  ;;  %v876_v50 = vsel %vm446_vm0, %v749_v34, 0.0  ;;  %v871_v6 = vsel %vm446_vm0, %v741_v37, 0.0  ;;  %v877_v61 = vsel %vm446_vm0, %v750_v45, 0.0  ;;  %v766_v51 = vcombine.high %v765_v56, %v765_v56 }
  0x65   : > { %v758_v52 = vcombine.high %v757_v46, %v757_v46  ;;  %v781_v53 = vrot.slane %v652_v43, %v2333_v5  ;;  %v872_v54 = vsel %vm446_vm0, %v742_v47, 0.0  ;;  %v773_v55 = vrot.slane %v651_v8, %v2333_v5 }
  0x66   : > { %v654_v62 = vmul.f32 %v2426_v18, %v2426_v18  ;;  %v653_v13 = vmul.f32 %v2429_v19, %v2429_v19  ;;  %v886_v57 = vsel %vm446_vm0, %v765_v56, 0.0  ;;  %v881_v58 = vsel %vm446_vm0, %v757_v46, 0.0 }
  0x67   : > { %v878_v14 = vadd.f32 %v877_v61, %v876_v50  ;;  %v873_v59 = vadd.f32 %v872_v54, %v871_v6  ;;  %v887_v60 = vsel %vm446_vm0, %v766_v51, 0.0  ;;  %v782_v63 = vcombine.high %v781_v53, %v781_v53 }
  0x68   : > { %839 = vadd.xlane.f32.xlu1 %v838_v11  ;;  %834 = vadd.xlane.f32.xlu0 %v833_v21  ;;  %v882_v0 = vsel %vm446_vm0, %v758_v52, 0.0  ;;  %v774_v1 = vcombine.high %v773_v55, %v773_v55  ;;  %v797_v2 = vrot.slane %v654_v62, %v2333_v5  ;;  %v789_v18 = vrot.slane %v653_v13, %v2333_v5 }
  0x69   : > { %v888_v19 = vadd.f32 %v887_v60, %v886_v57  ;;  %v883_v4 = vadd.f32 %v882_v0, %v881_v58  ;;  %v896_v9 = vsel %vm446_vm0, %v781_v53, 0.0  ;;  %v897_v10 = vsel %vm446_vm0, %v782_v63, 0.0 }
  0x6a   : > { %v891_v11 = vsel %vm446_vm0, %v773_v55, 0.0  ;;  %v892_v15 = vsel %vm446_vm0, %v774_v1, 0.0  ;;  %v798_v16 = vcombine.high %v797_v2, %v797_v2  ;;  %v790_v17 = vcombine.high %v789_v18, %v789_v18 }
  0x6b   : > { %v898_v20 = vadd.f32 %v897_v10, %v896_v9  ;;  %v893_v25 = vadd.f32 %v892_v15, %v891_v11  ;;  %v906_v5 = vsel %vm446_vm0, %v797_v2, 0.0  ;;  %v901_v21 = vsel %vm446_vm0, %v789_v18, 0.0 }
  0x6c   : > { %849 = vadd.xlane.f32.xlu1 %v848_v27  ;;  %844 = vadd.xlane.f32.xlu0 %v843_v31  ;;  %v907_v30 = vsel %vm446_vm0, %v798_v16, 0.0  ;;  %v902_v22 = vsel %vm446_vm0, %v790_v17, 0.0  ;;  %v2181_v26 = vmov 0  }
  0x6d   : > { %v908_v23 = vadd.f32 %v907_v30, %v906_v5  ;;  %v903_v24 = vadd.f32 %v902_v22, %v901_v21  ;;  %1982 = vset.pattern.permute.xlu1 %v2181_v26  ;;  %1981 = vset.pattern.permute.xlu0 %v2181_v26 }
  0x70   : > { %859 = vadd.xlane.f32.xlu1 %v858_v38  ;;  %854 = vadd.xlane.f32.xlu0 %v853_v39 }
  0x74   : > { %869 = vadd.xlane.f32.xlu1 %v868_v48  ;;  %864 = vadd.xlane.f32.xlu0 %v863_v49 }
  0x78   : > { %879 = vadd.xlane.f32.xlu1 %v878_v14  ;;  %874 = vadd.xlane.f32.xlu0 %v873_v59 }
  0x7c   : > { %889 = vadd.xlane.f32.xlu1 %v888_v19  ;;  %884 = vadd.xlane.f32.xlu0 %v883_v4 }
  0x80   : > { %899 = vadd.xlane.f32.xlu1 %v898_v20  ;;  %894 = vadd.xlane.f32.xlu0 %v893_v25 }
  0x84   : > { %909 = vadd.xlane.f32.xlu1 %v908_v23  ;;  %904 = vadd.xlane.f32.xlu0 %v903_v24 }
  0xd5   : > { %v461_v27 = vpop.xlane.xlu1 %460  ;;  %v451_v28 = vpop.xlane.xlu0 %450 }
  0xd6   : > { %v541_v29 = vsel %vm446_vm0, %v461_v27, 0.0  ;;  %v527_v12 = vsel %vm446_vm0, %v451_v28, 0.0 }
  0xd7   : > { %v542_v31 = vrot.slane %v541_v29, 4  ;;  %v528_v32 = vrot.slane %v527_v12, 4 }
  0xd9   : > { %v543_v7 = vadd.f32 %v542_v31, %v541_v29  ;;  %v529_v33 = vadd.f32 %v528_v32, %v527_v12  ;;  %v466_v34 = vpop.xlane.xlu1 %465  ;;  %v456_v35 = vpop.xlane.xlu0 %455 }
  0xda   : > { %v548_v36 = vsel %vm446_vm0, %v466_v34, 0.0  ;;  %v534_v37 = vsel %vm446_vm0, %v456_v35, 0.0 }
  0xdb   : > { %v544_v38 = vrot.slane %v543_v7, 2  ;;  %v530_v39 = vrot.slane %v529_v33, 2  ;;  %v549_v40 = vrot.slane %v548_v36, 4  ;;  %v535_v41 = vrot.slane %v534_v37, 4 }
  0xdd   : > { %v545_v42 = vadd.f32 %v544_v38, %v543_v7  ;;  %v531_v43 = vadd.f32 %v530_v39, %v529_v33  ;;  %v550_v44 = vadd.f32 %v549_v40, %v548_v36  ;;  %v536_v45 = vadd.f32 %v535_v41, %v534_v37  ;;  %v476_v56 = vpop.xlane.xlu1 %475  ;;  %v471_v46 = vpop.xlane.xlu0 %470 }
  0xde   : > { %v562_v47 = vsel %vm446_vm0, %v476_v56, 0.0  ;;  %v555_v8 = vsel %vm446_vm0, %v471_v46, 0.0 }
  0xdf   : > { %v546_v48 = vrot.slane %v545_v42, 1  ;;  %v532_v49 = vrot.slane %v531_v43, 1  ;;  %v551_v50 = vrot.slane %v550_v44, 2  ;;  %v537_v6 = vrot.slane %v536_v45, 2 }
  0xe0   : > { %v563_v61 = vrot.slane %v562_v47, 4  ;;  %v556_v51 = vrot.slane %v555_v8, 4 }
  0xe1   : > { %v547_v52 = vadd.f32 %v546_v48, %v545_v42  ;;  %v533_v53 = vadd.f32 %v532_v49, %v531_v43  ;;  %v552_v54 = vadd.f32 %v551_v50, %v550_v44  ;;  %v538_v55 = vadd.f32 %v537_v6, %v536_v45  ;;  %v486_v62 = vpop.xlane.xlu1 %485  ;;  %v481_v13 = vpop.xlane.xlu0 %480 }
  0xe2   : > { %v564_v57 = vadd.f32 %v563_v61, %v562_v47  ;;  %v557_v58 = vadd.f32 %v556_v51, %v555_v8  ;;  %v576_v14 = vsel %vm446_vm0, %v486_v62, 0.0  ;;  %v569_v59 = vsel %vm446_vm0, %v481_v13, 0.0 }
  0xe3   : > { %v2535_v60 = vmul.f32 0.001953125, %v547_v52  ;;  %v2537_v63 = vmul.f32 0.001953125, %v533_v53  ;;  %v553_v0 = vrot.slane %v552_v54, 1  ;;  %v539_v1 = vrot.slane %v538_v55, 1 }
  0xe4   : > { %v565_v2 = vrot.slane %v564_v57, 2  ;;  %v558_v18 = vrot.slane %v557_v58, 2  ;;  %v577_v19 = vrot.slane %v576_v14, 4  ;;  %v570_v4 = vrot.slane %v569_v59, 4 }
  0xe5   : > { %v2540_v9 = vmul.f32 %v2535_v60, %v547_v52  ;;  %v2543_v10 = vmul.f32 %v2537_v63, %v533_v53  ;;  %v554_v11 = vadd.f32 %v553_v0, %v552_v54  ;;  %v540_v15 = vadd.f32 %v539_v1, %v538_v55  ;;  %v496_v16 = vpop.xlane.xlu1 %495  ;;  %v491_v17 = vpop.xlane.xlu0 %490 }
  0xe6   : > { %v566_v20 = vadd.f32 %v565_v2, %v564_v57  ;;  %v559_v25 = vadd.f32 %v558_v18, %v557_v58  ;;  %v578_v5 = vadd.f32 %v577_v19, %v576_v14  ;;  %v571_v30 = vadd.f32 %v570_v4, %v569_v59 }
  0xe7   : > { %v2545_v21 = vmul.f32 0.001953125, %v554_v11  ;;  %v2547_v22 = vmul.f32 0.001953125, %v540_v15  ;;  %v590_v23 = vsel %vm446_vm0, %v496_v16, 0.0  ;;  %v583_v24 = vsel %vm446_vm0, %v491_v17, 0.0 }
  0xe8   : > { %v567_v26 = vrot.slane %v566_v20, 1  ;;  %v560_v27 = vrot.slane %v559_v25, 1  ;;  %v579_v28 = vrot.slane %v578_v5, 2  ;;  %v572_v29 = vrot.slane %v571_v30, 2 }
  0xe9   : > { %v2552_v12 = vmul.f32 %v2545_v21, %v554_v11  ;;  %v2555_v31 = vmul.f32 %v2547_v22, %v540_v15  ;;  %v591_v32 = vrot.slane %v590_v23, 4  ;;  %v584_v7 = vrot.slane %v583_v24, 4  ;;  %v506_v33 = vpop.xlane.xlu1 %505  ;;  %v501_v34 = vpop.xlane.xlu0 %500 }
  0xea   : > { %v568_v35 = vadd.f32 %v567_v26, %v566_v20  ;;  %v561_v36 = vadd.f32 %v560_v27, %v559_v25  ;;  %v580_v37 = vadd.f32 %v579_v28, %v578_v5  ;;  %v573_v38 = vadd.f32 %v572_v29, %v571_v30 }
  0xeb   : > { %v592_v39 = vadd.f32 %v591_v32, %v590_v23  ;;  %v585_v40 = vadd.f32 %v584_v7, %v583_v24  ;;  %v604_v41 = vsel %vm446_vm0, %v506_v33, 0.0  ;;  %v597_v42 = vsel %vm446_vm0, %v501_v34, 0.0 }
  0xec   : > { %v2559_v43 = vmul.f32 0.001953125, %v568_v35  ;;  %v2561_v44 = vmul.f32 0.001953125, %v561_v36  ;;  %v581_v45 = vrot.slane %v580_v37, 1  ;;  %v574_v56 = vrot.slane %v573_v38, 1 }
  0xed   : > { %v593_v46 = vrot.slane %v592_v39, 2  ;;  %v586_v47 = vrot.slane %v585_v40, 2  ;;  %v605_v8 = vrot.slane %v604_v41, 4  ;;  %v598_v48 = vrot.slane %v597_v42, 4  ;;  %v516_v49 = vpop.xlane.xlu1 %515  ;;  %v511_v50 = vpop.xlane.xlu0 %510 }
  0xee   : > { %v2564_v6 = vmul.f32 %v2559_v43, %v568_v35  ;;  %v2567_v61 = vmul.f32 %v2561_v44, %v561_v36  ;;  %v582_v51 = vadd.f32 %v581_v45, %v580_v37  ;;  %v575_v52 = vadd.f32 %v574_v56, %v573_v38 }
  0xef   : > { %v594_v53 = vadd.f32 %v593_v46, %v592_v39  ;;  %v587_v54 = vadd.f32 %v586_v47, %v585_v40  ;;  %v606_v55 = vadd.f32 %v605_v8, %v604_v41  ;;  %v599_v62 = vadd.f32 %v598_v48, %v597_v42 }
  0xf0   : > { %v2569_v13 = vmul.f32 0.001953125, %v582_v51  ;;  %v2571_v57 = vmul.f32 0.001953125, %v575_v52  ;;  %v618_v58 = vsel %vm446_vm0, %v516_v49, 0.0  ;;  %v611_v14 = vsel %vm446_vm0, %v511_v50, 0.0 }
  0xf1   : > { %v595_v59 = vrot.slane %v594_v53, 1  ;;  %v588_v0 = vrot.slane %v587_v54, 1  ;;  %v607_v1 = vrot.slane %v606_v55, 2  ;;  %v600_v2 = vrot.slane %v599_v62, 2  ;;  %v526_v18 = vpop.xlane.xlu1 %525  ;;  %v521_v19 = vpop.xlane.xlu0 %520 }
  0xf2   : > { %v2576_v4 = vmul.f32 %v2569_v13, %v582_v51  ;;  %v2579_v11 = vmul.f32 %v2571_v57, %v575_v52  ;;  %v619_v15 = vrot.slane %v618_v58, 4  ;;  %v612_v16 = vrot.slane %v611_v14, 4 }
  0xf3   : > { %v596_v17 = vadd.f32 %v595_v59, %v594_v53  ;;  %v589_v20 = vadd.f32 %v588_v0, %v587_v54  ;;  %v608_v25 = vadd.f32 %v607_v1, %v606_v55  ;;  %v601_v5 = vadd.f32 %v600_v2, %v599_v62 }
  0xf4   : > { %v620_v30 = vadd.f32 %v619_v15, %v618_v58  ;;  %v613_v23 = vadd.f32 %v612_v16, %v611_v14  ;;  %v632_v24 = vsel %vm446_vm0, %v526_v18, 0.0  ;;  %v625_v26 = vsel %vm446_vm0, %v521_v19, 0.0 }
  0xf5   : > { %v2583_v27 = vmul.f32 0.001953125, %v596_v17  ;;  %v2585_v28 = vmul.f32 0.001953125, %v589_v20  ;;  %v609_v29 = vrot.slane %v608_v25, 1  ;;  %v602_v32 = vrot.slane %v601_v5, 1  ;;  %v840_v7 = vpop.xlane.xlu1 %839  ;;  %v835_v33 = vpop.xlane.xlu0 %834 }
  0xf6   : > { %v621_v34 = vrot.slane %v620_v30, 2  ;;  %v614_v35 = vrot.slane %v613_v23, 2  ;;  %v633_v36 = vrot.slane %v632_v24, 4  ;;  %v626_v37 = vrot.slane %v625_v26, 4 }
  0xf7   : > { %v2588_v38 = vmul.f32 %v2583_v27, %v596_v17  ;;  %v2591_v39 = vmul.f32 %v2585_v28, %v589_v20  ;;  %v610_v40 = vadd.f32 %v609_v29, %v608_v25  ;;  %v603_v41 = vadd.f32 %v602_v32, %v601_v5 }
  0xf8   : > { %v622_v42 = vadd.f32 %v621_v34, %v620_v30  ;;  %v615_v45 = vadd.f32 %v614_v35, %v613_v23  ;;  %v634_v56 = vadd.f32 %v633_v36, %v632_v24  ;;  %v627_v46 = vadd.f32 %v626_v37, %v625_v26 }
  0xf9   : > { %v2593_v47 = vmul.f32 0.001953125, %v610_v40  ;;  %v2595_v8 = vmul.f32 0.001953125, %v603_v41  ;;  %v918_v48 = vsel %vm446_vm0, %v840_v7, 0.0  ;;  %v911_v49 = vsel %vm446_vm0, %v835_v33, 0.0  ;;  %v850_v50 = vpop.xlane.xlu1 %849  ;;  %v845_v51 = vpop.xlane.xlu0 %844 }
  0xfa   : > { %v623_v52 = vrot.slane %v622_v42, 1  ;;  %v616_v53 = vrot.slane %v615_v45, 1  ;;  %v635_v54 = vrot.slane %v634_v56, 2  ;;  %v628_v55 = vrot.slane %v627_v46, 2 }
  0xfb   : > { %v2600_v62 = vmul.f32 %v2593_v47, %v610_v40  ;;  %v2603_v58 = vmul.f32 %v2595_v8, %v603_v41  ;;  %v919_v14 = vrot.slane %v918_v48, 4  ;;  %v912_v59 = vrot.slane %v911_v49, 4 }
  0xfc   : > { %v624_v0 = vadd.f32 %v623_v52, %v622_v42  ;;  %v617_v1 = vadd.f32 %v616_v53, %v615_v45  ;;  %v636_v2 = vadd.f32 %v635_v54, %v634_v56  ;;  %v629_v18 = vadd.f32 %v628_v55, %v627_v46 }
  0xfd   : > { %v920_v19 = vadd.f32 %v919_v14, %v918_v48  ;;  %v913_v15 = vadd.f32 %v912_v59, %v911_v49  ;;  %v932_v16 = vsel %vm446_vm0, %v850_v50, 0.0  ;;  %v925_v17 = vsel %vm446_vm0, %v845_v51, 0.0  ;;  %v860_v20 = vpop.xlane.xlu1 %859  ;;  %v855_v25 = vpop.xlane.xlu0 %854 }
  0xfe   : > { %v2607_v5 = vmul.f32 0.001953125, %v624_v0  ;;  %v2609_v30 = vmul.f32 0.001953125, %v617_v1  ;;  %v637_v23 = vrot.slane %v636_v2, 1  ;;  %v630_v24 = vrot.slane %v629_v18, 1 }
  0xff   : > { %v921_v26 = vrot.slane %v920_v19, 2  ;;  %v914_v29 = vrot.slane %v913_v15, 2  ;;  %v933_v32 = vrot.slane %v932_v16, 4  ;;  %v926_v7 = vrot.slane %v925_v17, 4 }
 0x100   : > { %v2612_v33 = vmul.f32 %v2607_v5, %v624_v0  ;;  %v2615_v34 = vmul.f32 %v2609_v30, %v617_v1  ;;  %v638_v35 = vadd.f32 %v637_v23, %v636_v2  ;;  %v631_v36 = vadd.f32 %v630_v24, %v629_v18 }
 0x101   : > { %v922_v37 = vadd.f32 %v921_v26, %v920_v19  ;;  %v915_v40 = vadd.f32 %v914_v29, %v913_v15  ;;  %v934_v41 = vadd.f32 %v933_v32, %v932_v16  ;;  %v927_v42 = vadd.f32 %v926_v7, %v925_v17  ;;  %v870_v45 = vpop.xlane.xlu1 %869  ;;  %v865_v54 = vpop.xlane.xlu0 %864 }
 0x102   : > { %v2617_v56 = vmul.f32 0.001953125, %v638_v35  ;;  %v2619_v46 = vmul.f32 0.001953125, %v631_v36  ;;  %v946_v48 = vsel %vm446_vm0, %v860_v20, 0.0  ;;  %v939_v49 = vsel %vm446_vm0, %v855_v25, 0.0 }
 0x103   : > { %v923_v50 = vrot.slane %v922_v37, 1  ;;  %v916_v51 = vrot.slane %v915_v40, 1  ;;  %v935_v52 = vrot.slane %v934_v41, 2  ;;  %v928_v53 = vrot.slane %v927_v42, 2 }
 0x104   : > { %v2624_v55 = vmul.f32 %v2617_v56, %v638_v35  ;;  %v2627_v14 = vmul.f32 %v2619_v46, %v631_v36  ;;  %v947_v59 = vrot.slane %v946_v48, 4  ;;  %v940_v0 = vrot.slane %v939_v49, 4 }
 0x105   : > { %v924_v1 = vadd.f32 %v923_v50, %v922_v37  ;;  %v917_v2 = vadd.f32 %v916_v51, %v915_v40  ;;  %v936_v18 = vadd.f32 %v935_v52, %v934_v41  ;;  %v929_v19 = vadd.f32 %v928_v53, %v927_v42  ;;  %v880_v29 = vpop.xlane.xlu1 %879 }
 0x106   : > { %v948_v15 = vadd.f32 %v947_v59, %v946_v48  ;;  %v941_v16 = vadd.f32 %v940_v0, %v939_v49  ;;  %v960_v17 = vsel %vm446_vm0, %v870_v45, 0.0  ;;  %v953_v20 = vsel %vm446_vm0, %v865_v54, 0.0  ;;  %v875_v48 = vpop.xlane.xlu0 %874 }
 0x107   : > { %v1056_v25 = vsub.f32 %v924_v1, %v2555_v31  ;;  %v1055_v23 = vsub.f32 %v917_v2, %v2543_v10  ;;  %v937_v24 = vrot.slane %v936_v18, 1  ;;  %v930_v26 = vrot.slane %v929_v19, 1 }
 0x108   : > { %v949_v32 = vrot.slane %v948_v15, 2  ;;  %v942_v7 = vrot.slane %v941_v16, 2  ;;  %v961_v35 = vrot.slane %v960_v17, 4  ;;  %v954_v36 = vrot.slane %v953_v20, 4 }
 0x109   : > { %v1072_v37 = vmul.f32 0.0019569471, %v1056_v25  ;;  %v1071_v40 = vmul.f32 0.0019569471, %v1055_v23  ;;  %v938_v41 = vadd.f32 %v937_v24, %v936_v18  ;;  %v931_v42 = vadd.f32 %v930_v26, %v929_v19 }
 0x10a   : > { %v950_v49 = vadd.f32 %v949_v32, %v948_v15  ;;  %v943_v45 = vadd.f32 %v942_v7, %v941_v16  ;;  %v962_v50 = vadd.f32 %v961_v35, %v960_v17  ;;  %v955_v51 = vadd.f32 %v954_v36, %v953_v20  ;;  %v890_v15 = vpop.xlane.xlu1 %889  ;;  %v885_v24 = vpop.xlane.xlu0 %884 }
 0x10b   : > { %v2633_v52 = vmax.f32 %v1072_v37, 0.0  ;;  %v2635_v31 = vmax.f32 %v1071_v40, 0.0  ;;  %v1058_v10 = vsub.f32 %v938_v41, %v2552_v12  ;;  %v1057_v53 = vsub.f32 %v931_v42, %v2540_v9 }
 0x10c   : > { %v951_v54 = vrot.slane %v950_v49, 1  ;;  %v944_v59 = vrot.slane %v943_v45, 1  ;;  %v963_v0 = vrot.slane %v962_v50, 2  ;;  %v956_v1 = vrot.slane %v955_v51, 2 }
 0x10d   : > { %1983 = vrsqrt.f32 %v2633_v52  ;;  %v1074_v2 = vmul.f32 0.0019569471, %v1058_v10  ;;  %v1073_v18 = vmul.f32 0.0019569471, %v1057_v53  ;;  %v974_v19 = vsel %vm446_vm0, %v880_v29, 0.0 }
 0x10e   : > { %1985 = vrsqrt.f32 %v2635_v31  ;;  %v952_v16 = vadd.f32 %v951_v54, %v950_v49  ;;  %v945_v17 = vadd.f32 %v944_v59, %v943_v45  ;;  %v964_v20 = vadd.f32 %v963_v0, %v962_v50 }
 0x10f   : > { %v2642_v25 = vmax.f32 %v1074_v2, 0.0  ;;  %v2644_v12 = vmax.f32 %v1073_v18, 0.0  ;;  %v957_v9 = vadd.f32 %v956_v1, %v955_v51  ;;  %v975_v23 = vrot.slane %v974_v19, 4  ;;  %v900_v51 = vpop.xlane.xlu1 %899  ;;  %v895_v2 = vpop.xlane.xlu0 %894 }
 0x110   : > { %v1060_v26 = vsub.f32 %v952_v16, %v2564_v6  ;;  %v1059_v32 = vsub.f32 %v945_v17, %v2567_v61  ;;  %v965_v7 = vrot.slane %v964_v20, 1  ;;  %v967_v29 = vsel %vm446_vm0, %v875_v48, 0.0 }
 0x111   : > { %1987 = vrsqrt.f32 %v2642_v25  ;;  %v958_v35 = vrot.slane %v957_v9, 1  ;;  %v976_v36 = vadd.f32 %v975_v23, %v974_v19  ;;  %v968_v37 = vrot.slane %v967_v29, 4 }
 0x112   : > { %1989 = vrsqrt.f32 %v2644_v12  ;;  %v1076_v40 = vmul.f32 0.0019569471, %v1060_v26  ;;  %v1075_v41 = vmul.f32 0.0019569471, %v1059_v32  ;;  %v966_v42 = vadd.f32 %v965_v7, %v964_v20 }
 0x113   : > { %v959_v49 = vadd.f32 %v958_v35, %v957_v9  ;;  %v977_v45 = vrot.slane %v976_v36, 2  ;;  %v969_v50 = vadd.f32 %v968_v37, %v967_v29  ;;  %v988_v6 = vsel %vm446_vm0, %v890_v15, 0.0 }
 0x114   : > { %v2652_v61 = vmax.f32 %v1076_v40, 0.0  ;;  %v2654_v10 = vmax.f32 %v1075_v41, 0.0  ;;  %v1062_v48 = vsub.f32 %v966_v42, %v2576_v4  ;;  %v989_v53 = vrot.slane %v988_v6, 4 }
 0x115   : > { %v1061_v54 = vsub.f32 %v959_v49, %v2579_v11  ;;  %v978_v59 = vadd.f32 %v977_v45, %v976_v36  ;;  %v970_v0 = vrot.slane %v969_v50, 2  ;;  %v981_v1 = vsel %vm446_vm0, %v885_v24, 0.0  ;;  %v910_v36 = vpop.xlane.xlu1 %909 }
 0x116   : > { %1991 = vrsqrt.f32 %v2652_v61  ;;  %v1078_v18 = vmul.f32 0.0019569471, %v1062_v48  ;;  %v990_v19 = vadd.f32 %v989_v53, %v988_v6  ;;  %v982_v15 = vrot.slane %v981_v1, 4  ;;  %v905_v6 = vpop.xlane.xlu0 %904 }
 0x117   : > { %v1984_v16 = vpop.eup %1983  ;;  %1993 = vrsqrt.f32 %v2654_v10  ;;  %v1077_v17 = vmul.f32 0.0019569471, %v1061_v54  ;;  %v979_v20 = vrot.slane %v978_v59, 1  ;;  %v971_v9 = vadd.f32 %v970_v0, %v969_v50 }
 0x118   : > { %v2661_v4 = vpop.eup %1985  ;;  %v2663_v23 = vmax.f32 %v1078_v18, 0.0  ;;  %v991_v11 = vrot.slane %v990_v19, 2  ;;  %v983_v26 = vadd.f32 %v982_v15, %v981_v1  ;;  %v1002_v24 = vsel %vm446_vm0, %v900_v51, 0.0 }
 0x119   : > { %v2666_v32 = vmax.f32 %v1077_v17, 0.0  ;;  %v980_v7 = vadd.f32 %v979_v20, %v978_v59  ;;  %v972_v29 = vrot.slane %v971_v9, 1  ;;  %v1003_v35 = vrot.slane %v1002_v24, 4 }
 0x11a   : > { %1995 = vrsqrt.f32 %v2663_v23  ;;  %v992_v37 = vadd.f32 %v991_v11, %v990_v19  ;;  %v984_v40 = vrot.slane %v983_v26, 2  ;;  %v995_v41 = vsel %vm446_vm0, %v895_v2, 0.0 }
 0x11b   : > { %v2670_v42 = vpop.eup %1987  ;;  %1997 = vrsqrt.f32 %v2666_v32  ;;  %v1064_v49 = vsub.f32 %v980_v7, %v2588_v38  ;;  %v973_v45 = vadd.f32 %v972_v29, %v971_v9  ;;  %v1004_v50 = vadd.f32 %v1003_v35, %v1002_v24 }
 0x11c   : > { %v2674_v51 = vpop.eup %1989  ;;  %v993_v48 = vrot.slane %v992_v37, 1  ;;  %v985_v53 = vadd.f32 %v984_v40, %v983_v26  ;;  %v996_v54 = vrot.slane %v995_v41, 4  ;;  %v1016_v59 = vsel %vm446_vm0, %v910_v36, 0.0 }
 0x11d   : > { %v1080_v0 = vmul.f32 0.0019569471, %v1064_v49  ;;  %v1063_v1 = vsub.f32 %v973_v45, %v2591_v39  ;;  %v1005_v2 = vrot.slane %v1004_v50, 2  ;;  %v1017_v18 = vrot.slane %v1016_v59, 4 }
 0x11e   : > { %v994_v19 = vadd.f32 %v993_v48, %v992_v37  ;;  %v986_v15 = vrot.slane %v985_v53, 1  ;;  %v997_v17 = vadd.f32 %v996_v54, %v995_v41  ;;  %v1009_v38 = vsel %vm446_vm0, %v905_v6, 0.0 }
 0x11f   : > { %v2679_v20 = vmax.f32 %v1080_v0, 0.0  ;;  %v1079_v9 = vmul.f32 0.0019569471, %v1063_v1  ;;  %v1006_v11 = vadd.f32 %v1005_v2, %v1004_v50  ;;  %v1018_v24 = vadd.f32 %v1017_v18, %v1016_v59 }
 0x120   : > { %v2681_v7 = vpop.eup %1991  ;;  %v1066_v26 = vsub.f32 %v994_v19, %v2600_v62  ;;  %v987_v29 = vadd.f32 %v986_v15, %v985_v53  ;;  %v998_v35 = vrot.slane %v997_v17, 2  ;;  %v1010_v36 = vrot.slane %v1009_v38, 4 }
 0x121   : > { %v2684_v39 = vpop.eup %1993  ;;  %1999 = vrsqrt.f32 %v2679_v20  ;;  %v2687_v37 = vmax.f32 %v1079_v9, 0.0  ;;  %v1007_v40 = vrot.slane %v1006_v11, 1  ;;  %v1019_v41 = vrot.slane %v1018_v24, 2 }
 0x122   : > { %v1082_v49 = vmul.f32 0.0019569471, %v1066_v26  ;;  %v1065_v45 = vsub.f32 %v987_v29, %v2603_v58  ;;  %v999_v50 = vadd.f32 %v998_v35, %v997_v17  ;;  %v1011_v6 = vadd.f32 %v1010_v36, %v1009_v38 }
 0x123   : > { %2001 = vrsqrt.f32 %v2687_v37  ;;  %v1008_v48 = vadd.f32 %v1007_v40, %v1006_v11  ;;  %v1020_v62 = vadd.f32 %v1019_v41, %v1018_v24  ;;  %v1111_v53 = vmul.f32 %v1984_v16, %v2633_v52 }
 0x124   : > { %v2692_v54 = vpop.eup %1995  ;;  %v2694_v59 = vmax.f32 %v1082_v49, 0.0  ;;  %v1081_v0 = vmul.f32 0.0019569471, %v1065_v45  ;;  %v1000_v1 = vrot.slane %v999_v50, 1  ;;  %v1012_v2 = vrot.slane %v1011_v6, 2 }
 0x125   : > { %v2696_v18 = vpop.eup %1997  ;;  %v1068_v19 = vsub.f32 %v1008_v48, %v2612_v33  ;;  %v1021_v58 = vrot.slane %v1020_v62, 1  ;;  %vm1112_vm1 = vcmp.eq.f32.partialorder %v2633_v52, inf  ;;  %vm1114_vm2 = vcmp.eq.f32.partialorder %v2633_v52, 0.0 }
 0x126   : > { %2003 = vrsqrt.f32 %v2694_v59  ;;  %v2702_v15 = vmax.f32 %v1081_v0, 0.0  ;;  %v1001_v16 = vadd.f32 %v1000_v1, %v999_v50  ;;  %v1013_v17 = vadd.f32 %v1012_v2, %v1011_v6 }
 0x127   : > { %v1084_v38 = vmul.f32 0.0019569471, %v1068_v19  ;;  %v1022_v9 = vadd.f32 %v1021_v58, %v1020_v62  ;;  %v1113_v11 = vsel %vm1112_vm1, %v2633_v52, %v1111_v53  ;;  %v1115_v24 = vand.u32 2147483648, %v2633_v52 }
 0x128   : > { %2005 = vrsqrt.f32 %v2702_v15  ;;  %v1067_v33 = vsub.f32 %v1001_v16, %v2615_v34  ;;  %v1014_v26 = vrot.slane %v1013_v17, 1  ;;  %v1104_v29 = vmul.f32 %v2661_v4, %v2635_v31 }
 0x129   : > { %v2710_v35 = vmax.f32 %v1084_v38, 0.0  ;;  %v1070_v36 = vsub.f32 %v1022_v9, %v2624_v55  ;;  %v1116_v40 = vsel %vm1114_vm2, %v1115_v24, %v1113_v11  ;;  %vm1105_vm3 = vcmp.eq.f32.partialorder %v2635_v31, inf }
 0x12a   : > { %v1083_v41 = vmul.f32 0.0019569471, %v1067_v33  ;;  %v1015_v49 = vadd.f32 %v1014_v26, %v1013_v17  ;;  %v1216_v45 = vadd.f32 1e-10, %v1116_v40  ;;  %v1106_v52 = vsel %vm1105_vm3, %v2635_v31, %v1104_v29 }
 0x12b   : > { %v2000_v50 = vpop.eup %1999  ;;  %2007 = vrsqrt.f32 %v2710_v35  ;;  %v1086_v34 = vmul.f32 0.0019569471, %v1070_v36  ;;  %vm1107_vm4 = vcmp.eq.f32.partialorder %v2635_v31, 0.0  ;;  %v1108_v4 = vand.u32 2147483648, %v2635_v31 }
 0x12c   : > { %v2718_v6 = vmax.f32 %v1083_v41, 0.0  ;;  %v1069_v55 = vsub.f32 %v1015_v49, %v2627_v14  ;;  %2009 = vrcp.f32 %v1216_v45  ;;  %v1118_v48 = vmul.f32 %v2674_v51, %v2644_v12 }
 0x12d   : > { %v2723_v62 = vpop.eup %2001  ;;  %v2725_v53 = vmax.f32 %v1086_v34, 0.0  ;;  %v1109_v0 = vsel %vm1107_vm4, %v1108_v4, %v1106_v52  ;;  %vm1119_vm5 = vcmp.eq.f32.partialorder %v2644_v12, inf  ;;  %vm1121_vm6 = vcmp.eq.f32.partialorder %v2644_v12, 0.0 }
 0x12e   : > { %2011 = vrsqrt.f32 %v2718_v6  ;;  %v1085_v31 = vmul.f32 0.0019569471, %v1069_v55  ;;  %v1215_v1 = vadd.f32 1e-10, %v1109_v0  ;;  %v1120_v2 = vsel %vm1119_vm5, %v2644_v12, %v1118_v48 }
 0x12f   : > { %2013 = vrsqrt.f32 %v2725_v53  ;;  %v1122_v14 = vand.u32 2147483648, %v2644_v12  ;;  %v1125_v51 = vmul.f32 %v2670_v42, %v2642_v25  ;;  %vm1126_vm7 = vcmp.eq.f32.partialorder %v2642_v25, inf }
 0x130   : > { %v2004_v19 = vpop.eup %2003  ;;  %v2736_v58 = vmax.f32 %v1085_v31, 0.0  ;;  %2015 = vrcp.f32 %v1215_v1  ;;  %vm1128_vm8 = vcmp.eq.f32.partialorder %v2642_v25, 0.0  ;;  %v1129_v16 = vand.u32 2147483648, %v2642_v25 }
 0x131   : > { %v1123_v17 = vsel %vm1121_vm6, %v1122_v14, %v1120_v2  ;;  %v1127_v38 = vsel %vm1126_vm7, %v2642_v25, %v1125_v51  ;;  %v1132_v9 = vmul.f32 %v2684_v39, %v2654_v10  ;;  %vm1133_vm9 = vcmp.eq.f32.partialorder %v2654_v10, inf  ;;  %v1248_v39 = vld [vmem:[%s3119_s1 + $0x2] sm:$0x3] }
 0x132   : > { %v2744_v12 = vpop.eup %2005  ;;  %2017 = vrsqrt.f32 %v2736_v58  ;;  %v1217_v42 = vadd.f32 1e-10, %v1123_v17  ;;  %v1130_v11 = vsel %vm1128_vm8, %v1129_v16, %v1127_v38  ;;  %vm1135_vm10 = vcmp.eq.f32.partialorder %v2654_v10, 0.0 }
 0x133   : > { %v1218_v24 = vadd.f32 1e-10, %v1130_v11  ;;  %v1134_v33 = vsel %vm1133_vm9, %v2654_v10, %v1132_v9  ;;  %v1136_v26 = vand.u32 2147483648, %v2654_v10  ;;  %v1167_v25 = vmul.f32 %v2000_v50, %v2679_v20 }
 0x134   : > { %2019 = vrcp.f32 %v1217_v42  ;;  %vm1168_vm11 = vcmp.eq.f32.partialorder %v2679_v20, inf  ;;  %vm1170_vm12 = vcmp.eq.f32.partialorder %v2679_v20, 0.0  ;;  %v1171_v29 = vand.u32 2147483648, %v2679_v20 }
 0x135   : > { %v2008_v36 = vpop.eup %2007  ;;  %2021 = vrcp.f32 %v1218_v24  ;;  %v1137_v40 = vsel %vm1135_vm10, %v1136_v26, %v1134_v33  ;;  %v1169_v41 = vsel %vm1168_vm11, %v2679_v20, %v1167_v25  ;;  %v1139_v10 = vmul.f32 %v2681_v7, %v2652_v61  ;;  %v1247_v20 = vld [vmem:[%s3119_s1] sm:$0x3]  ;;  %v1250_v26 = vld [vmem:[%s3119_s1 + $0x6] sm:$0x3] }
 0x136   : > { %v2010_v49 = vpop.eup %2009  ;;  %v1219_v45 = vadd.f32 1e-10, %v1137_v40  ;;  %v1172_v52 = vsel %vm1170_vm12, %v1171_v29, %v1169_v41  ;;  %vm1140_vm13 = vcmp.eq.f32.partialorder %v2652_v61, inf  ;;  %vm1142_vm14 = vcmp.eq.f32.partialorder %v2652_v61, 0.0 }
 0x137   : > { %v2762_v50 = vmul.f32 %v2010_v49, %v1248_v39  ;;  %v1224_v34 = vadd.f32 1e-10, %v1172_v52  ;;  %v1141_v4 = vsel %vm1140_vm13, %v2652_v61, %v1139_v10  ;;  %v1143_v55 = vand.u32 2147483648, %v2652_v61 }
 0x138   : > { %v2766_v48 = vpop.eup %2011  ;;  %2023 = vrcp.f32 %v1219_v45  ;;  %v1181_v7 = vmul.f32 %v2004_v19, %v2694_v59  ;;  %vm1182_vm15 = vcmp.eq.f32.partialorder %v2694_v59, inf  ;;  %vm1184_vm0 = vcmp.eq.f32.partialorder %v2694_v59, 0.0 }
 0x139   : > { %v2014_v0 = vpop.eup %2013  ;;  %1333 = vperm.xlu1 %1982, %v2762_v50   ;;  %2025 = vrcp.f32 %v1224_v34  ;;  %v1144_v31 = vsel %vm1142_vm14, %v1143_v55, %v1141_v4  ;;  %v1185_v61 = vand.u32 2147483648, %v2694_v59  ;;  %v1146_v1 = vmul.f32 %v2696_v18, %v2666_v32  ;;  %v1249_v18 = vld [vmem:[%s3119_s1 + $0x4] sm:$0x3] }
 0x13a   : > { %v2016_v2 = vpop.eup %2015  ;;  %v1220_v14 = vadd.f32 1e-10, %v1144_v31  ;;  %v1183_v51 = vsel %vm1182_vm15, %v2694_v59, %v1181_v7  ;;  %vm1147_vm1 = vcmp.eq.f32.partialorder %v2666_v32, inf  ;;  %vm1149_vm2 = vcmp.eq.f32.partialorder %v2666_v32, 0.0 }
 0x13b   : > { %v2781_v19 = vmul.f32 %v2016_v2, %v1247_v20  ;;  %v1186_v16 = vsel %vm1184_vm0, %v1185_v61, %v1183_v51  ;;  %v1148_v17 = vsel %vm1147_vm1, %v2666_v32, %v1146_v1  ;;  %v1150_v38 = vand.u32 2147483648, %v2666_v32  ;;  %v1251_v20 = vld [vmem:[%s3119_s1 + $0x8] sm:$0x3] }
 0x13c   : > { %v2785_v9 = vpop.eup %2017  ;;  %2027 = vrcp.f32 %v1220_v14  ;;  %v1226_v42 = vadd.f32 1e-10, %v1186_v16  ;;  %v1195_v59 = vmul.f32 %v2008_v36, %v2710_v35  ;;  %vm1196_vm3 = vcmp.eq.f32.partialorder %v2710_v35, inf }
 0x13d   : > { %1329 = vperm.xlu0 %1981, %v2781_v19   ;;  %v1151_v11 = vsel %vm1149_vm2, %v1150_v38, %v1148_v17  ;;  %vm1198_vm4 = vcmp.eq.f32.partialorder %v2710_v35, 0.0  ;;  %v1199_v24 = vand.u32 2147483648, %v2710_v35  ;;  %v1153_v32 = vmul.f32 %v2692_v54, %v2663_v23 }
 0x13e   : > { %v2020_v33 = vpop.eup %2019  ;;  %2029 = vrcp.f32 %v1226_v42  ;;  %v1221_v25 = vadd.f32 1e-10, %v1151_v11  ;;  %v1197_v39 = vsel %vm1196_vm3, %v2710_v35, %v1195_v59  ;;  %vm1154_vm5 = vcmp.eq.f32.partialorder %v2663_v23, inf  ;;  %v1256_v35 = vld [vmem:[%s3119_s1 + $0x12] sm:$0x3] }
 0x13f   : > { %v2022_v29 = vpop.eup %2021  ;;  %v2802_v36 = vmul.f32 %v2020_v33, %v1249_v18  ;;  %v1200_v40 = vsel %vm1198_vm4, %v1199_v24, %v1197_v39  ;;  %v1155_v41 = vsel %vm1154_vm5, %v2663_v23, %v1153_v32  ;;  %vm1156_vm6 = vcmp.eq.f32.partialorder %v2663_v23, 0.0  ;;  %v1260_v32 = vld [vmem:[%s3119_s1 + $0x1a] sm:$0x3] }
 0x140   : > { %v1228_v10 = vadd.f32 1e-10, %v1200_v40  ;;  %v1157_v54 = vand.u32 2147483648, %v2663_v23  ;;  %v2808_v49 = vmul.f32 %v2022_v29, %v1250_v26  ;;  %2031 = vrcp.f32 %v1221_v25  ;;  %v1253_v40 = vld [vmem:[%s3119_s1 + $0xc] sm:$0x3] }
 0x141   : > { %1337 = vperm.xlu1 %1982, %v2802_v36   ;;  %v1209_v45 = vmul.f32 %v2014_v0, %v2725_v53  ;;  %vm1210_vm7 = vcmp.eq.f32.partialorder %v2725_v53, inf  ;;  %v1213_v4 = vand.u32 2147483648, %v2725_v53  ;;  %v1160_v23 = vmul.f32 %v2723_v62, %v2687_v37 }
 0x142   : > { %v2024_v52 = vpop.eup %2023  ;;  %2033 = vrcp.f32 %v1228_v10  ;;  %v1158_v34 = vsel %vm1156_vm6, %v1157_v54, %v1155_v41  ;;  %vm1212_vm8 = vcmp.eq.f32.partialorder %v2725_v53, 0.0  ;;  %vm1161_vm9 = vcmp.eq.f32.partialorder %v2687_v37, inf }
 0x143   : > { %v2026_v55 = vpop.eup %2025  ;;  %v1222_v7 = vadd.f32 1e-10, %v1158_v34  ;;  %v1211_v31 = vsel %vm1210_vm7, %v2725_v53, %v1209_v45  ;;  %v1162_v1 = vsel %vm1161_vm9, %v2687_v37, %v1160_v23  ;;  %v1164_v2 = vand.u32 2147483648, %v2687_v37  ;;  %v1258_v53 = vld [vmem:[%s3119_s1 + $0x16] sm:$0x3] }
 0x144   : > { %v2824_v0 = vmul.f32 %v2026_v55, %v1256_v35  ;;  %v1214_v61 = vsel %vm1212_vm8, %v1213_v4, %v1211_v31  ;;  %vm1163_vm10 = vcmp.eq.f32.partialorder %v2687_v37, 0.0  ;;  %v1174_v14 = vmul.f32 %v2744_v12, %v2702_v15  ;;  %v1252_v12 = vld [vmem:[%s3119_s1 + $0xa] sm:$0x3]  ;;  %v1262_v45 = vld [vmem:[%s3119_s1 + $0x1e] sm:$0x3] }
 0x145   : > { %1341 = vperm.xlu1 %1982, %v2808_v49   ;;  %v1230_v62 = vadd.f32 1e-10, %v1214_v61  ;;  %v2832_v16 = vmul.f32 %v2024_v52, %v1251_v20  ;;  %2035 = vrcp.f32 %v1222_v7  ;;  %v1165_v17 = vsel %vm1163_vm10, %v1164_v2, %v1162_v1  ;;  %v1254_v4 = vld [vmem:[%s3119_s1 + $0xe] sm:$0x3]  ;;  %v1264_v31 = vld [vmem:[%s3120_s2 + $0x2] sm:$0x3] }
 0x146   : > { %v2028_v51 = vpop.eup %2027  ;;  %1365 = vperm.xlu0 %1981, %v2824_v0   ;;  %v1223_v38 = vadd.f32 1e-10, %v1165_v17  ;;  %vm1175_vm11 = vcmp.eq.f32.partialorder %v2702_v15, inf  ;;  %v1178_v37 = vand.u32 2147483648, %v2702_v15  ;;  %vm1177_vm12 = vcmp.eq.f32.partialorder %v2702_v15, 0.0 }
 0x147   : > { %2037 = vrcp.f32 %v1230_v62  ;;  %v1176_v42 = vsel %vm1175_vm11, %v2702_v15, %v1174_v14  ;;  %v1188_v59 = vmul.f32 %v2766_v48, %v2718_v6  ;;  %vm1189_vm13 = vcmp.eq.f32.partialorder %v2718_v6, inf  ;;  %v1255_v1 = vld [vmem:[%s3119_s1 + $0x10] sm:$0x3] }
 0x148   : > { %v2030_v18 = vpop.eup %2029  ;;  %v1179_v24 = vsel %vm1177_vm12, %v1178_v37, %v1176_v42  ;;  %2039 = vrcp.f32 %v1223_v38  ;;  %v1192_v15 = vand.u32 2147483648, %v2718_v6  ;;  %v1284_v39 = vmul.f32 %v2028_v51, %v1252_v12  ;;  %v1257_v51 = vld [vmem:[%s3119_s1 + $0x14] sm:$0x3]  ;;  %v1259_v37 = vld [vmem:[%s3119_s1 + $0x18] sm:$0x3] }
 0x149   : > { %1345 = vperm.xlu1 %1982, %v2832_v16   ;;  %v2848_v11 = vmul.f32 %v2030_v18, %v1258_v53  ;;  %v1225_v33 = vadd.f32 1e-10, %v1179_v24  ;;  %v1190_v26 = vsel %vm1189_vm13, %v2718_v6, %v1188_v59  ;;  %vm1191_vm14 = vcmp.eq.f32.partialorder %v2718_v6, 0.0  ;;  %v1261_v24 = vld [vmem:[%s3119_s1 + $0x1c] sm:$0x3] }
 0x14a   : > { %v2032_v25 = vpop.eup %2031  ;;  %v1202_v48 = vmul.f32 %v2785_v9, %v2736_v58  ;;  %v1193_v41 = vsel %vm1191_vm14, %v1192_v15, %v1190_v26  ;;  %vm1203_vm15 = vcmp.eq.f32.partialorder %v2736_v58, inf  ;;  %v1206_v35 = vand.u32 2147483648, %v2736_v58  ;;  %v1272_v15 = vld [vmem:[%s3120_s2 + $0x12] sm:$0x3] }
 0x14b   : > { %1373 = vperm.xlu0 %1981, %v2848_v11   ;;  %2041 = vrcp.f32 %v1225_v33  ;;  %v1227_v6 = vadd.f32 1e-10, %v1193_v41  ;;  %vm1205_vm0 = vcmp.eq.f32.partialorder %v2736_v58, 0.0  ;;  %v2869_v9 = vmul.f32 %v2032_v25, %v1253_v40  ;;  %v1263_v25 = vld [vmem:[%s3120_s2] sm:$0x3] }
 0x14c   : > { %v2034_v29 = vpop.eup %2033  ;;  %v1204_v54 = vsel %vm1203_vm15, %v2736_v58, %v1202_v48  ;;  %v1296_v58 = vmul.f32 %v2762_v50, %v2547_v22  ;;  %v1298_v62 = vmul.f32 %v2808_v49, %v2545_v21  ;;  %v1266_v50 = vld [vmem:[%s3120_s2 + $0x6] sm:$0x3]  ;;  %v1300_v17 = vmul.f32 %v1284_v39, %v2559_v43  ;;  %v1268_v21 = vld [vmem:[%s3120_s2 + $0xa] sm:$0x3]  ;;  %v1270_v43 = vld [vmem:[%s3120_s2 + $0xe] sm:$0x3] }
 0x14d   : > { %1349 = vperm.xlu1 %1982, %v1284_v39   ;;  %v2864_v10 = vmul.f32 %v2034_v29, %v1260_v32  ;;  %v1207_v52 = vsel %vm1205_vm0, %v1206_v35, %v1204_v54  ;;  %2043 = vrcp.f32 %v1227_v6  ;;  %v1304_v33 = vmul.f32 %v2824_v0, %v2583_v27 }
 0x14e   : > { %v1229_v20 = vadd.f32 1e-10, %v1207_v52  ;;  %v1312_v2 = vsub.f32 %v1264_v31, %v1296_v58  ;;  %v1314_v53 = vsub.f32 %v1266_v50, %v1298_v62  ;;  %v1316_v18 = vsub.f32 %v1268_v21, %v1300_v17  ;;  %v1273_v52 = vld [vmem:[%s3120_s2 + $0x14] sm:$0x3] }
 0x14f   : > { %1381 = vperm.xlu0 %1981, %v2864_v10   ;;  %v2036_v34 = vpop.eup %2035  ;;  %v1320_v39 = vsub.f32 %v1272_v15, %v1304_v33  ;;  %v1306_v48 = vmul.f32 %v2848_v11, %v2593_v47  ;;  %v1297_v27 = vmul.f32 %v2802_v36, %v2535_v60  ;;  %v1308_v40 = vmul.f32 %v2864_v10, %v2607_v5  ;;  %v1276_v60 = vld [vmem:[%s3120_s2 + $0x1a] sm:$0x3]  ;;  %v1267_v36 = vld [vmem:[%s3120_s2 + $0x8] sm:$0x3] }
 0x150   : > { %v1286_v7 = vmul.f32 %v2036_v34, %v1254_v4  ;;  %2045 = vrcp.f32 %v1229_v20  ;;  %v1299_v47 = vmul.f32 %v2832_v16, %v2561_v44  ;;  %v1301_v5 = vmul.f32 %v2869_v9, %v2571_v57  ;;  %v1278_v44 = vld [vmem:[%s3120_s2 + $0x1e] sm:$0x3]  ;;  %v1269_v16 = vld [vmem:[%s3120_s2 + $0xc] sm:$0x3] }
 0x151   : > { %v2038_v23 = vpop.eup %2037  ;;  %1353 = vperm.xlu1 %1982, %v2869_v9   ;;  %v1324_v11 = vsub.f32 %v1276_v60, %v1308_v40 }
 0x152   : > { %v1294_v55 = vmul.f32 %v2038_v23, %v1262_v45  ;;  %v2040_v61 = vpop.eup %2039  ;;  %v1302_v12 = vmul.f32 %v1286_v7, %v2569_v13  ;;  %v1295_v13 = vmul.f32 %v2781_v19, %v2537_v63  ;;  %v1274_v63 = vld [vmem:[%s3120_s2 + $0x16] sm:$0x3]  ;;  %v1265_v19 = vld [vmem:[%s3120_s2 + $0x4] sm:$0x3]  ;;  %v1315_v35 = vsub.f32 %v1267_v36, %v1299_v47 }
 0x153   : > { %v1287_v22 = vmul.f32 %v2040_v61, %v1255_v1  ;;  %v1322_v0 = vsub.f32 %v1274_v63, %v1306_v48  ;;  %v1313_v41 = vsub.f32 %v1265_v19, %v1297_v27  ;;  %v1317_v6 = vsub.f32 %v1269_v16, %v1301_v5  ;;  %v2051_v5 = vld [vmem:[%s2324_s21 + $0x24] sm:$0xf] }
 0x154   : > { %1389 = vperm.xlu0 %1981, %v1294_v55   ;;  %v1318_v32 = vsub.f32 %v1270_v43, %v1302_v12  ;;  %v1311_v29 = vsub.f32 %v1263_v25, %v1295_v13  ;;  %v1310_v54 = vmul.f32 %v1294_v55, %v2617_v56  ;;  %v1271_v56 = vld [vmem:[%s3120_s2 + $0x10] sm:$0x3]  ;;  %v2182_v1 = vmov 269488144  }
 0x155   : > { %1357 = vperm.xlu1 %1982, %v1286_v7   ;;  %v2042_v14 = vpop.eup %2041  ;;  %v1303_v45 = vmul.f32 %v1287_v22, %v2585_v28  ;;  %v1275_v28 = vld [vmem:[%s3120_s2 + $0x18] sm:$0x3] }
 0x156   : > { %v1289_v38 = vmul.f32 %v2042_v14, %v1257_v51  ;;  %v1326_v10 = vsub.f32 %v1278_v44, %v1310_v54 }
 0x157   : > { %v2044_v49 = vpop.eup %2043  ;;  %v1319_v57 = vsub.f32 %v1271_v56, %v1303_v45  ;;  %v2052_v45 = vld [vmem:[%s2324_s21] sm:$0xf] }
 0x158   : > { %1541 = vperm.xlu0 %1981, %v1312_v2   ;;  %v1291_v42 = vmul.f32 %v2044_v49, %v1259_v37  ;;  %v1305_v9 = vmul.f32 %v1289_v38, %v2595_v8  ;;  %v1277_v8 = vld [vmem:[%s3120_s2 + $0x1c] sm:$0x3]  ;;  %v1392_v2 = vunpack.c.l.s4 %v2182_v1  ;;  %v2047_v37 = vld [vmem:[%s2324_s21 + $0x4] sm:$0xf] }
 0x159   : > { %1361 = vperm.xlu1 %1982, %v1287_v22  }
 0x15a   : > { %v2046_v59 = vpop.eup %2045  ;;  %v1321_v34 = vsub.f32 %v1273_v52, %v1305_v9  ;;  %v1307_v4 = vmul.f32 %v1291_v42, %v2609_v30 }
 0x15b   : > { %v1293_v26 = vmul.f32 %v2046_v59, %v1261_v24  ;;  %v2048_v24 = vld [vmem:[%s2324_s21 + $0xc] sm:$0xf] }
 0x15c   : > { %1549 = vperm.xlu0 %1981, %v1314_v53   ;;  %v1323_v23 = vsub.f32 %v1275_v28, %v1307_v4  ;;  %v2053_v28 = vld [vmem:[%s2324_s21 + $0x2c] sm:$0xf] }
 0x15d   : > { %1369 = vperm.xlu1 %1982, %v1289_v38   ;;  %v1309_v55 = vmul.f32 %v1293_v26, %v2619_v46  ;;  %v1393_v46 = vunpack.c.0.s8 %v1392_v2 }
 0x15f   : > { %v1325_v58 = vsub.f32 %v1277_v8, %v1309_v55  ;;  %v2971_v51 = vsub.s32 %v1393_v46, %v2330_v3 }
 0x160   : > { %1557 = vperm.xlu0 %1981, %v1316_v18  }
 0x161   : > { %1377 = vperm.xlu1 %1982, %v1291_v42  }
 0x164   : > { %1565 = vperm.xlu0 %1981, %v1318_v32  }
 0x165   : > { %1385 = vperm.xlu1 %1982, %v1293_v26  }
 0x168   : > { %1573 = vperm.xlu0 %1981, %v1320_v39   ;;  %v2049_v39 = vld [vmem:[%s2324_s21 + $0x14] sm:$0xf] }
 0x169   : > { %1537 = vperm.xlu1 %1982, %v1311_v29  }
 0x16c   : > { %1581 = vperm.xlu0 %1981, %v1322_v0  }
 0x16d   : > { %1545 = vperm.xlu1 %1982, %v1313_v41   ;;  %v2050_v41 = vld [vmem:[%s2324_s21 + $0x1c] sm:$0xf] }
 0x170   : > { %1589 = vperm.xlu0 %1981, %v1324_v11  }
 0x171   : > { %1553 = vperm.xlu1 %1982, %v1315_v35  }
 0x174   : > { %1597 = vperm.xlu0 %1981, %v1326_v10  }
 0x175   : > { %1561 = vperm.xlu1 %1982, %v1317_v6  }
 0x179   : > { %1569 = vperm.xlu1 %1982, %v1319_v57  }
 0x17d   : > { %1577 = vperm.xlu1 %1982, %v1321_v34  }
 0x181   : > { %1585 = vperm.xlu1 %1982, %v1323_v23  }
 0x185   : > { %1593 = vperm.xlu1 %1982, %v1325_v58  }
 0x1b8   : > { %v1334_v20 = vpop.permute.xlu1 %1333 }
 0x1b9   : > { %v1404_v38 = vrot.slane %v1334_v20, %v2971_v51  ;;  %v2054_v20 = vld [vmem:[%s2324_s21 + $0x8] sm:$0xf] }
 0x1bb   : > { %v1520_v18 = vmul.f32 %v2047_v37, %v1404_v38 }
 0x1bc   : > { %v1330_v31 = vpop.permute.xlu0 %1329 }
 0x1bd   : > { %v1397_v11 = vrot.slane %v1330_v31, %v2971_v51 }
 0x1bf   : > { %v1519_v56 = vmul.f32 %v2052_v45, %v1397_v11 }
 0x1c0   : > { %v2964_v7 = vpop.permute.xlu1 %1337 }
 0x1c1   : > { %v1411_v57 = vrot.slane %v2964_v7, %v2971_v51 }
 0x1c3   : > { %v1521_v31 = vmul.f32 %v2054_v20, %v1411_v57 }
 0x1c4   : > { %v1342_v30 = vpop.permute.xlu1 %1341 }
 0x1c5   : > { %v1366_v61 = vpop.permute.xlu0 %1365  ;;  %v1418_v12 = vrot.slane %v1342_v30, %v2971_v51 }
 0x1c6   : > { %v1460_v40 = vrot.slane %v1366_v61, %v2971_v51 }
 0x1c7   : > { %v1522_v32 = vmul.f32 %v2048_v24, %v1418_v12 }
 0x1c8   : > { %v2966_v62 = vpop.permute.xlu1 %1345  ;;  %v1528_v44 = vmul.f32 %v2051_v5, %v1460_v40  ;;  %v2060_v40 = vld [vmem:[%s2324_s21 + $0x28] sm:$0xf] }
 0x1c9   : > { %v1425_v7 = vrot.slane %v2966_v62, %v2971_v51 }
 0x1ca   : > { %v1374_v22 = vpop.permute.xlu0 %1373 }
 0x1cb   : > { %v1474_v16 = vrot.slane %v1374_v22, %v2971_v51  ;;  %v2055_v22 = vld [vmem:[%s2324_s21 + $0x34] sm:$0xf] }
 0x1cc   : > { %v1350_v50 = vpop.permute.xlu1 %1349 }
 0x1cd   : > { %v1432_v33 = vrot.slane %v1350_v50, %v2971_v51  ;;  %v1530_v23 = vmul.f32 %v2053_v28, %v1474_v16 }
 0x1ce   : > { %v2968_v14 = vpop.permute.xlu0 %1381 }
 0x1cf   : > { %v1524_v48 = vmul.f32 %v2049_v39, %v1432_v33  ;;  %v1488_v55 = vrot.slane %v2968_v14, %v2971_v51 }
 0x1d0   : > { %v2973_v53 = vpop.permute.xlu1 %1353 }
 0x1d1   : > { %v1532_v46 = vmul.f32 %v2055_v22, %v1488_v55 }
 0x1d3   : > { %v2975_v17 = vpop.permute.xlu0 %1389 }
 0x1d4   : > { %v1358_v21 = vpop.permute.xlu1 %1357  ;;  %v1502_v50 = vrot.slane %v2975_v17, %v2971_v51  ;;  %v2057_v17 = vld [vmem:[%s2324_s21 + $0x3c] sm:$0xf] }
 0x1d5   : > { %v1446_v29 = vrot.slane %v1358_v21, %v2971_v51  ;;  %v2056_v21 = vld [vmem:[%s2324_s21 + $0x10] sm:$0xf] }
 0x1d6   : > { %v1523_v62 = vmul.f32 %v2056_v21, %v1425_v7 }
 0x1d7   : > { %v1542_v49 = vpop.permute.xlu0 %1541  ;;  %v1526_v47 = vmul.f32 %v2050_v41, %v1446_v29 }
 0x1d8   : > { %v2980_v42 = vpop.permute.xlu1 %1361  ;;  %v1612_v43 = vrot.slane %v1542_v49, %v2971_v51  ;;  %v1439_v49 = vrot.slane %v2973_v53, %v2971_v51 }
 0x1d9   : > { %v1453_v53 = vrot.slane %v2980_v42, %v2971_v51 }
 0x1da   : > { %v1728_v3 = vadd.f32 %v1612_v43, %v1520_v18 }
 0x1db   : > { %v1550_v59 = vpop.permute.xlu0 %1549 }
 0x1dc   : > { %v2985_v26 = vpop.permute.xlu1 %1369  ;;  %1744 = vst [vmem:[%s2989_s29 + $0x4] sm:$0xf] %v1728_v3  ;;  %v1626_v13 = vrot.slane %v1550_v59, %v2971_v51  ;;  %v1534_v3 = vmul.f32 %v2057_v17, %v1502_v50 }
 0x1de   : > { %v1730_v15 = vadd.f32 %v1626_v13, %v1522_v32  ;;  %v2058_v32 = vld [vmem:[%s2324_s21 + $0x18] sm:$0xf] }
 0x1df   : > { %v1558_v25 = vpop.permute.xlu0 %1557  ;;  %v1525_v33 = vmul.f32 %v2058_v32, %v1439_v49 }
 0x1e0   : > { %v2995_v27 = vpop.permute.xlu1 %1377  ;;  %1746 = vst [vmem:[%s2989_s29 + $0xc] sm:$0xf] %v1730_v15  ;;  %v1640_v63 = vrot.slane %v1558_v25, %v2971_v51 }
 0x1e2   : > { %v1732_v19 = vadd.f32 %v1640_v63, %v1524_v48  ;;  %v2059_v48 = vld [vmem:[%s2324_s21 + $0x20] sm:$0xf]  ;;  %v1467_v63 = vrot.slane %v2985_v26, %v2971_v51  ;;  %v2061_v26 = vld [vmem:[%s2324_s21 + $0x30] sm:$0xf] }
 0x1e3   : > { %v1566_v0 = vpop.permute.xlu0 %1565  ;;  %v1527_v29 = vmul.f32 %v2059_v48, %v1453_v53 }
 0x1e4   : > { %v3001_v60 = vpop.permute.xlu1 %1385  ;;  %1748 = vst [vmem:[%s2989_s29 + $0x14] sm:$0xf] %v1732_v19  ;;  %v1654_v36 = vrot.slane %v1566_v0, %v2971_v51  ;;  %v1529_v41 = vmul.f32 %v2060_v40, %v1467_v63 }
 0x1e5   : > { %v1495_v5 = vrot.slane %v3001_v60, %v2971_v51 }
 0x1e6   : > { %v1734_v54 = vadd.f32 %v1654_v36, %v1526_v47  ;;  %v1481_v47 = vrot.slane %v2995_v27, %v2971_v51 }
 0x1e7   : > { %v1574_v35 = vpop.permute.xlu0 %1573 }
 0x1e8   : > { %v1538_v10 = vpop.permute.xlu1 %1537  ;;  %1750 = vst [vmem:[%s2989_s29 + $0x1c] sm:$0xf] %v1734_v54  ;;  %v1668_v6 = vrot.slane %v1574_v35, %v2971_v51  ;;  %v1531_v35 = vmul.f32 %v2061_v26, %v1481_v47 }
 0x1e9   : > { %v1605_v9 = vrot.slane %v1538_v10, %v2971_v51  ;;  %v2062_v10 = vld [vmem:[%s2324_s21 + $0x38] sm:$0xf]  ;;  %s2183_s21 = smov [#allocation5]  }
 0x1ea   : > { %v1736_v52 = vadd.f32 %v1668_v6, %v1528_v44  ;;  %v1533_v6 = vmul.f32 %v2062_v10, %v1495_v5  ;;  %s2097_s24 = sshll.u32 %s2183_s21, 4  ;;  %s2098_s24 = int_to_ptr.vmem [resolvable:$false] %s2097_s24 }
 0x1eb   : > { %v1727_v34 = vadd.f32 %v1605_v9, %v1519_v56  ;;  %v1582_v4 = vpop.permute.xlu0 %1581  ;;  %s2099_s6 = scalar_lea.vmem %s2098_s24, 2048  ;;  %p2100_p6 = scmp.lt.s32.totalorder %s3068_s30, %s2098_s24 }
 0x1ec   : > { %v1546_v8 = vpop.permute.xlu1 %1545  ;;  %1752 = vst [vmem:[%s2989_s29 + $0x24] sm:$0xf] %v1736_v52  ;;  %v1682_v58 = vrot.slane %v1582_v4, %v2971_v51  ;;  %p2101_p13 = scmp.lt.s32.totalorder %s2099_s6, %s2093_s19 }
 0x1ed   : > { %1743 = vst [vmem:[%s2989_s29] sm:$0xf] %v1727_v34  ;;  %v1619_v30 = vrot.slane %v1546_v8, %v2971_v51 }
 0x1ee   : > { %v1738_v61 = vadd.f32 %v1682_v58, %v1530_v23  ;;  %p2102_p2 = por %p2101_p13, %p2100_p6 }
 0x1ef   : > { %v1729_v1 = vadd.f32 %v1619_v30, %v1521_v31  ;;  %v1590_v2 = vpop.permute.xlu0 %1589 }
 0x1f0   : > { %v1554_v14 = vpop.permute.xlu1 %1553  ;;  %1754 = vst [vmem:[%s2989_s29 + $0x2c] sm:$0xf] %v1738_v61  ;;  %v1696_v38 = vrot.slane %v1590_v2, %v2971_v51  ;;  %p2103_p5 = pnand %p2102_p2, %p2096_p0 }
 0x1f1   : > { %1745 = vst [vmem:[%s2989_s29 + $0x8] sm:$0xf] %v1729_v1  ;;  %v1633_v37 = vrot.slane %v1554_v14, %v2971_v51 }
 0x1f2   : > { %v1740_v18 = vadd.f32 %v1696_v38, %v1532_v46 }
 0x1f3   : > { %v1731_v12 = vadd.f32 %v1633_v37, %v1523_v62  ;;  %v1598_v43 = vpop.permute.xlu0 %1597 }
 0x1f4   : > { %v1562_v59 = vpop.permute.xlu1 %1561  ;;  %1756 = vst [vmem:[%s2989_s29 + $0x34] sm:$0xf] %v1740_v18  ;;  %v1710_v24 = vrot.slane %v1598_v43, %v2971_v51 }
 0x1f5   : > { %1747 = vst [vmem:[%s2989_s29 + $0x10] sm:$0xf] %v1731_v12  ;;  %v1647_v13 = vrot.slane %v1562_v59, %v2971_v51 }
 0x1f6   : > { %v1742_v15 = vadd.f32 %v1710_v24, %v1534_v3 }
 0x1f7   : > { %v1733_v25 = vadd.f32 %v1647_v13, %v1525_v33 }
 0x1f8   : > { %v1570_v39 = vpop.permute.xlu1 %1569  ;;  %1758 = vst [vmem:[%s2989_s29 + $0x3c] sm:$0xf] %v1742_v15 }
 0x1f9   : > { %1749 = vst [vmem:[%s2989_s29 + $0x18] sm:$0xf] %v1733_v25  ;;  %v1661_v19 = vrot.slane %v1570_v39, %v2971_v51 }
 0x1fb   : > { %v1735_v42 = vadd.f32 %v1661_v19, %v1527_v29 }
 0x1fc   : > { %v1578_v0 = vpop.permute.xlu1 %1577 }
 0x1fd   : > { %1751 = vst [vmem:[%s2989_s29 + $0x20] sm:$0xf] %v1735_v42  ;;  %v1675_v36 = vrot.slane %v1578_v0, %v2971_v51 }
 0x1ff   : > { %v1737_v11 = vadd.f32 %v1675_v36, %v1529_v41 }
 0x200   : > { %v1586_v54 = vpop.permute.xlu1 %1585 }
 0x201   : > { %1753 = vst [vmem:[%s2989_s29 + $0x28] sm:$0xf] %v1737_v11  ;;  %v1689_v44 = vrot.slane %v1586_v54, %v2971_v51 }
 0x203   : > { %v1739_v16 = vadd.f32 %v1689_v44, %v1531_v35 }
 0x204   : > { %v1594_v27 = vpop.permute.xlu1 %1593 }
 0x205   : > { %1755 = vst [vmem:[%s2989_s29 + $0x30] sm:$0xf] %v1739_v16  ;;  %v1703_v45 = vrot.slane %v1594_v27, %v2971_v51 }
 0x207   : > { %v1741_v60 = vadd.f32 %v1703_v45, %v1533_v6 }
 0x209   : > { %1757 = vst [vmem:[%s2989_s29 + $0x38] sm:$0xf] %v1741_v60 }
 0x20a   : > { %2106 = shalt.err (!%p2103_p5)
}
 0x20b   : > { %s2107_s8 = scalar_lea.hbm %s3066_s7, 1024  ;;  %s2111_s22 = scalar_lea.hbm %s3121_s3, 2048 }
 0x20c   : > { %p2108_p4 = scmp.ne.s32.totalorder %s3066_s7, %s2107_s8  ;;  %p2112_p12 = scmp.lt.u32.totalorder %s3066_s7, %s3121_s3 }
 0x20d   : > { %p2113_p1 = scmp.lt.u32.totalorder %s2111_s22, %s2107_s8  ;;  %p2115_p8 = scmp.lt.u32.totalorder %s2107_s8, %s3066_s7 }
 0x20e   : > { %p2109_p7 = pnand %p2108_p4, %p3129_p9 }
 0x20f   : > { %p2114_p3 = por %p2113_p1, %p2112_p12 }
 0x210   : > { %p2110_p10 = pneg %p2109_p7 }
 0x211   : > { %p2116_p11 = por %p2115_p8, %p2114_p3 }
 0x213   : > { %p2117_p0 = pnand %p2116_p11, %p2110_p10 }
 0x215   : > { %2120 = shalt.err (!%p2117_p0)
}
 0x216   : > { %s2184_s29 = smov 64   ;;  %s2185_s18 = smov 4  }
 0x217   : > { %1914 = dma.vmem_to_hbm [thread:$0]  (%p3129_p9), %s3068_s30, 1024, %s3066_s7, %s1760_s15, %s2184_s29, %s2184_s29, %s2185_s18  }
 0x218 PF: > { %s1791_s4 = sand.u32 1, %s2155_s12   ;;  %p3130_p6 = scmp.ne.s32.totalorder %s3126_s27, 0 }
 0x219   : > { %p3131_p13 = scmp.ge.s32.totalorder %s2175_s17, 2  ;;  %s1792_s5 = scalar_lea.sflag [#allocation4], %s1791_s4 }
 0x21b   : > { %p1921_p2 = pnand %p3131_p13, %p3130_p6 }
 0x21d   : > { %2150 = dma.done.wait (!%p1921_p2), %s1792_s5, 1024  }
 0x21e   : > { %2152 = vsyncadd (!%p1921_p2), %s1792_s5, 4294966272  ;;  %s19_s17 = sadd.s32 1, %s2175_s17   ;;  %s3132_s12 = smov %s2159_s13 }
 0x21f   : > { %p16_p5 = scmp.ge.s32.totalorder %s19_s17, 4   ;;  %s3133_s13 = smov %s2163_s14 }
 0x220   : > { %s3134_s14 = smov %s2262_s26  ;;  %s3135_s15 = smov %s2171_s16 }
 0x221   : > { %s3136_s16 = smov %s3138_s20  ;;  %18 = sbr.rel (!%p16_p5) target bundleno = 6 (0x6), region = 83 }
 0x228   :  { %1797 = vsyncpa [#allocation3], 1 }
 0x229   :  { %1799 = vsyncpa [#allocation3 + $0x1], 1 }
 0x22a   :  { %1800 = vsyncpa [#allocation4], 1 }
 0x22b   :  { %1802 = vsyncpa [#allocation4 + $0x1], 1 }

</bundles_post_ra>
